<compile_context>
chip_gen: v6e
topology: v6e:2x2x1
jax: 0.10.0
libtpu: 0.0.40
codegen_flags: <defaults>
</compile_context>

<pallas_src>
import jax
import jax.numpy as jnp
import numpy as np
from jax.experimental import pallas as pl
from jax.experimental.pallas import tpu as pltpu

BN_EPS = 1e-5
HEAD = 500
HEAD_PAD = 512     # 500 padded to a multiple of 128 (lane-dense intermediate)
OUT = 5
OUT_PAD = 128      # 5 padded to one full lane width (unmasked final store)

# PyTorch gate order is [i, f, g, o]; fused lane order is [i, f, o, g] so that the
# sigmoid gates (i, f, o) are contiguous and tanh applies only to the trailing 2H lanes.
GATE_ORDER = (0, 1, 3, 2)


# --------------------------------------------------------------------------------------
# Kernel
# --------------------------------------------------------------------------------------
def _fused_bilstm(proj, whh_fused, fwd_gate_mask, fwd_half_mask, B, T, H):
    """Run one bidirectional LSTM layer with both directions fused per step.

    proj:       (T*B, 8H) gate pre-activations (input projection + bias) for BOTH
                directions, time-major; fused gate/lane layout is
                [i_f i_b | f_f f_b | o_f o_b | g_f g_b], each sub-block width H.
    whh_fused:  (2H, 8H) block-diagonal recurrent weights (fwd rows feed fwd columns,
                bwd rows feed bwd columns, exact zeros elsewhere), same gate layout.
    Returns a list of T time-aligned outputs y[t] = [h_fwd[t] | h_bwd[t]] of shape (B, 2H).
    """
    H2 = 2 * H

    h = jnp.zeros((B, H2), jnp.float32)       # [h_fwd | h_bwd]
    c = jnp.zeros((B, H2), jnp.float32)       # [c_fwd | c_bwd]
    steps = [None] * T                        # step s: fwd@time s, bwd@time T-1-s
    for s in range(T):                        # static unroll (T is tiny)
        r = T - 1 - s
        proj_s = proj[s * B:(s + 1) * B, :]
        if r == s:
            gate_in = proj_s
        else:
            proj_r = proj[r * B:(r + 1) * B, :]
            gate_in = jnp.where(fwd_gate_mask, proj_s, proj_r)

        # gate = gate_in + h @ W_hh (single fused matmul for both directions).
        gates = gate_in + jnp.dot(h, whh_fused, preferred_element_type=jnp.float32)

        # EUP pushes only on the lanes that need them: sigmoid over 6H, tanh over 2H.
        sg = jax.nn.sigmoid(gates[:, :3 * H2])
        g = jnp.tanh(gates[:, 3 * H2:])
        i = sg[:, 0 * H2:1 * H2]
        f = sg[:, 1 * H2:2 * H2]
        o = sg[:, 2 * H2:3 * H2]

        c = f * c + i * g
        h = o * jnp.tanh(c)
        steps[s] = h

    # Re-assemble time-aligned bidirectional outputs [fwd[t] | bwd[t]].
    outs = [None] * T
    for t in range(T):
        r = T - 1 - t
        if r == t:
            outs[t] = steps[t]
        else:
            outs[t] = jnp.where(fwd_half_mask, steps[t], steps[r])
    return outs


def seq_learn_kernel(
    x_flat_ref,   # (B, T*H)     input.reshape(B, -1) for the residual
    x_tb_ref,     # (T*B, H)     time-major input for the batched layer-0 projection
    wih0_ref,     # (H, 8H)      layer-0 fused input weights (both directions)
    whh0_ref,     # (2H, 8H)     layer-0 fused block-diagonal recurrent weights
    b0_ref,       # (1, 8H)      layer-0 fused bias (b_ih + b_hh, both directions)
    wih1_ref,     # (2H, 8H)     layer-1 fused input weights
    whh1_ref,     # (2H, 8H)     layer-1 fused block-diagonal recurrent weights
    b1_ref,       # (1, 8H)      layer-1 fused bias
    w1_hbm_ref,   # (3*T*H, 512) first Linear of `lin` (BN folded in), bf16, in HBM
    bvec1_ref,    # (1, 512)     first Linear bias with BN folded in (f32)
    w2_hbm_ref,   # (512, 128)   second Linear, transposed + padded, bf16, in HBM
    bvec2_ref,    # (1, 128)
    out_ref,      # (B, 128)     padded output (wrapper slices [:, :5])
    w1_vmem,      # scratch: (3*T*H, 512) bf16
    w2_vmem,      # scratch: (512, 128) bf16
    dma_sems,     # scratch: DMA semaphores (2,)
):
    B = x_flat_ref.shape[0]
    H = x_tb_ref.shape[1]
    T = x_tb_ref.shape[0] // B
    H2, H8 = 2 * H, 8 * H

    # ------------------- kick off head-weight DMAs (overlap with the LSTM) -----------
    w1_cp = pltpu.make_async_copy(w1_hbm_ref, w1_vmem, dma_sems.at[0])
    w2_cp = pltpu.make_async_copy(w2_hbm_ref, w2_vmem, dma_sems.at[1])
    w1_cp.start()
    w2_cp.start()

    # Direction-select lane masks (built once, shared by both layers).
    lane8 = jax.lax.broadcasted_iota(jnp.int32, (1, H8), 1)
    fwd_gate_mask = (lane8 % H2) < H          # True on forward-direction gate lanes
    lane2 = jax.lax.broadcasted_iota(jnp.int32, (1, H2), 1)
    fwd_half_mask = lane2 < H                 # True on the forward half of the state

    # ------------------- LSTM layer 0 (bidirectional, fused) -------------------
    # One batched input projection for all time steps and both directions; bias hoisted.
    proj0 = jnp.dot(x_tb_ref[...], wih0_ref[...],
                    preferred_element_type=jnp.float32) + b0_ref[...]
    y0 = _fused_bilstm(proj0, whh0_ref[...], fwd_gate_mask, fwd_half_mask, B, T, H)

    # ------------------- LSTM layer 1 (bidirectional, fused) -------------------
    # (inter-layer dropout is identity in eval mode)
    y0_all = jnp.concatenate(y0, axis=0)                     # (T*B, 2H), time-major
    proj1 = jnp.dot(y0_all, wih1_ref[...],
                    preferred_element_type=jnp.float32) + b1_ref[...]
    y1 = _fused_bilstm(proj1, whh1_ref[...], fwd_gate_mask, fwd_half_mask, B, T, H)

    # ------------------- residual concat + MLP head -------------------
    # residual = cat([input.reshape(B, T*H), lstm_out.view(B, 2*T*H)], dim=1)
    residual = jnp.concatenate([x_flat_ref[...]] + y1, axis=1)   # (B, 3*T*H)

    # First Linear (BatchNorm folded in at pack time), bf16 weights, f32 accumulate.
    w1_cp.wait()
    z = jnp.dot(residual.astype(jnp.bfloat16), w1_vmem[...],
                preferred_element_type=jnp.float32) + bvec1_ref[...]   # (B, 512)
    z = jnp.maximum(z, 0.0)                                   # ReLU

    # Second Linear.
    w2_cp.wait()
    out = jnp.dot(z.astype(jnp.bfloat16), w2_vmem[...],
                  preferred_element_type=jnp.float32) + bvec2_ref[...]  # (B, 128)
    out_ref[...] = out.astype(out_ref.dtype)


def seq_learn_forward(x, kp):
    """Wrapper: single Pallas program; head weights stream in behind the recurrence."""
    B, T, H = x.shape
    D_in = 3 * T * H
    x_flat = x.reshape(B, T * H)                                   # residual view
    x_tb = jnp.transpose(x, (1, 0, 2)).reshape(T * B, H)           # time-major view
    args = (
        x_flat, x_tb,
        kp["wih0"], kp["whh0"], kp["b0"],
        kp["wih1"], kp["whh1"], kp["b1"],
        kp["w1"], kp["b1vec"],
        kp["w2"], kp["b2vec"],
    )
    vmem_spec = pl.BlockSpec(memory_space=pltpu.MemorySpace.VMEM)
    hbm_spec = pl.BlockSpec(memory_space=pl.ANY)
    in_specs = [
        vmem_spec, vmem_spec,                 # x_flat, x_tb
        vmem_spec, vmem_spec, vmem_spec,      # wih0, whh0, b0
        vmem_spec, vmem_spec, vmem_spec,      # wih1, whh1, b1
        hbm_spec, vmem_spec,                  # w1 (manual DMA), b1vec
        hbm_spec, vmem_spec,                  # w2 (manual DMA), b2vec
    ]
    out_pad = pl.pallas_call(
        seq_learn_kernel,
        out_shape=jax.ShapeDtypeStruct((B, OUT_PAD), jnp.float32),
        in_specs=in_specs,
        out_specs=pl.BlockSpec(memory_space=pltpu.MemorySpace.VMEM),
        scratch_shapes=[
            pltpu.VMEM((D_in, HEAD_PAD), jnp.bfloat16),
            pltpu.VMEM((HEAD_PAD, OUT_PAD), jnp.bfloat16),
            pltpu.SemaphoreType.DMA((2,)),
        ],
    )(*args)
    return out_pad[:, :OUT]


# --------------------------------------------------------------------------------------
# Deterministic parameter construction (PyTorch layout), fused packing, JAX reference
# --------------------------------------------------------------------------------------
def init_params(key, H, T, lookback):
    D_in = 2 * H * lookback + H
    assert D_in == 3 * T * H, "shape constraint of the Residual branch"
    keys = iter(jax.random.split(key, 64))

    def u(shape, bound):
        return jax.random.uniform(next(keys), shape, jnp.float32, -bound, bound)

    s = 1.0 / np.sqrt(H)
    pt = {}
    for suf, in_sz in [("l0", H), ("l0r", H), ("l1", 2 * H), ("l1r", 2 * H)]:
        pt[f"wih_{suf}"] = u((4 * H, in_sz), s)
        pt[f"whh_{suf}"] = u((4 * H, H), s)
        pt[f"bih_{suf}"] = u((4 * H,), s)
        pt[f"bhh_{suf}"] = u((4 * H,), s)
    pt["W1"] = u((HEAD, D_in), 1.0 / np.sqrt(D_in))
    pt["bb1"] = u((HEAD,), 1.0 / np.sqrt(D_in))
    pt["gamma"] = jnp.ones((HEAD,), jnp.float32)
    pt["beta"] = jnp.zeros((HEAD,), jnp.float32)
    pt["rmean"] = jnp.zeros((HEAD,), jnp.float32)
    pt["rvar"] = jnp.ones((HEAD,), jnp.float32)
    pt["W2"] = u((OUT, HEAD), 1.0 / np.sqrt(HEAD))
    pt["bb2"] = u((OUT,), 1.0 / np.sqrt(HEAD))
    return pt


def _fuse_ih(w_f, w_b, H):
    """(4H, In) fwd/bwd PyTorch input weights -> (In, 8H), lanes [i_f i_b f_f f_b o_f o_b g_f g_b]."""
    wf_t, wb_t = w_f.T, w_b.T                 # (In, 4H), columns [i f g o]
    cols = []
    for g in GATE_ORDER:
        cols.append(wf_t[:, g * H:(g + 1) * H])
        cols.append(wb_t[:, g * H:(g + 1) * H])
    return jnp.concatenate(cols, axis=1)


def _fuse_hh(w_f, w_b, H):
    """(4H, H) fwd/bwd recurrent weights -> block-diagonal (2H, 8H) (exact zeros off-diag)."""
    wf_t, wb_t = w_f.T, w_b.T                 # (H, 4H)
    z = jnp.zeros((H, H), jnp.float32)
    cols = []
    for g in GATE_ORDER:
        fwd_block = jnp.concatenate([wf_t[:, g * H:(g + 1) * H], z], axis=0)  # (2H, H)
        bwd_block = jnp.concatenate([z, wb_t[:, g * H:(g + 1) * H]], axis=0)  # (2H, H)
        cols.append(fwd_block)
        cols.append(bwd_block)
    return jnp.concatenate(cols, axis=1)      # (2H, 8H)


def _fuse_bias(bih_f, bhh_f, bih_b, bhh_b, H):
    bf = bih_f + bhh_f
    bb = bih_b + bhh_b
    parts = []
    for g in GATE_ORDER:
        parts.append(bf[g * H:(g + 1) * H])
        parts.append(bb[g * H:(g + 1) * H])
    return jnp.concatenate(parts)[None, :]    # (1, 8H)


def pack_params(pt, H):
    kp = {}
    kp["wih0"] = _fuse_ih(pt["wih_l0"], pt["wih_l0r"], H)                     # (H, 8H)
    kp["whh0"] = _fuse_hh(pt["whh_l0"], pt["whh_l0r"], H)                     # (2H, 8H)
    kp["b0"] = _fuse_bias(pt["bih_l0"], pt["bhh_l0"], pt["bih_l0r"], pt["bhh_l0r"], H)
    kp["wih1"] = _fuse_ih(pt["wih_l1"], pt["wih_l1r"], H)                     # (2H, 8H)
    kp["whh1"] = _fuse_hh(pt["whh_l1"], pt["whh_l1r"], H)                     # (2H, 8H)
    kp["b1"] = _fuse_bias(pt["bih_l1"], pt["bhh_l1"], pt["bih_l1r"], pt["bhh_l1r"], H)

    pad_h = HEAD_PAD - HEAD
    pad_o = OUT_PAD - OUT

    # Fold eval-mode BatchNorm into the first Linear: y = (xW1^T + b1)*a + c
    #                                                   = x(W1*a)^T + (b1*a + c)
    a = pt["gamma"] / jnp.sqrt(pt["rvar"] + BN_EPS)
    c = pt["beta"] - pt["rmean"] * a
    W1_folded = pt["W1"] * a[:, None]                                         # (HEAD, D_in)
    b1_folded = pt["bb1"] * a + c

    kp["w1"] = jnp.pad(W1_folded.T, ((0, 0), (0, pad_h))).astype(jnp.bfloat16)   # (D_in, 512)
    kp["b1vec"] = jnp.pad(b1_folded, (0, pad_h))[None, :]                        # (1, 512)
    kp["w2"] = jnp.pad(pt["W2"].T, ((0, pad_h), (0, pad_o))).astype(jnp.bfloat16)  # (512, 128)
    kp["b2vec"] = jnp.pad(pt["bb2"], (0, pad_o))[None, :]                        # (1, 128)
    return kp


def reference_forward(x, pt, H):
    """Pure-JAX (eval-mode) re-implementation of Seq_learn.forward for verification."""
    B, T, _ = x.shape

    def run_dir(xs, wih, whh, bih, bhh, reverse):
        h = jnp.zeros((B, H), jnp.float32)
        c = jnp.zeros((B, H), jnp.float32)
        order = range(T - 1, -1, -1) if reverse else range(T)
        outs = [None] * T
        for t in order:
            g = xs[:, t, :] @ wih.T + h @ whh.T + bih + bhh
            i = jax.nn.sigmoid(g[:, :H])
            f = jax.nn.sigmoid(g[:, H:2 * H])
            gg = jnp.tanh(g[:, 2 * H:3 * H])
            o = jax.nn.sigmoid(g[:, 3 * H:])
            c = f * c + i * gg
            h = o * jnp.tanh(c)
            outs[t] = h
        return jnp.stack(outs, axis=1)

    f0 = run_dir(x, pt["wih_l0"], pt["whh_l0"], pt["bih_l0"], pt["bhh_l0"], False)
    b0 = run_dir(x, pt["wih_l0r"], pt["whh_l0r"], pt["bih_l0r"], pt["bhh_l0r"], True)
    y0 = jnp.concatenate([f0, b0], axis=-1)
    f1 = run_dir(y0, pt["wih_l1"], pt["whh_l1"], pt["bih_l1"], pt["bhh_l1"], False)
    b1 = run_dir(y0, pt["wih_l1r"], pt["whh_l1r"], pt["bih_l1r"], pt["bhh_l1r"], True)
    y1 = jnp.concatenate([f1, b1], axis=-1)                   # (B, T, 2H)

    residual = jnp.concatenate([x.reshape(B, -1), y1.reshape(B, -1)], axis=1)
    z = residual @ pt["W1"].T + pt["bb1"]
    z = (z - pt["rmean"]) / jnp.sqrt(pt["rvar"] + BN_EPS) * pt["gamma"] + pt["beta"]
    z = jnp.maximum(z, 0.0)
    return z @ pt["W2"].T + pt["bb2"]


# --------------------------------------------------------------------------------------
if __name__ == "__main__":
    B, T, H, LOOKBACK = 8, 3, 32, 4   # 2*H*LOOKBACK + H == 3*T*H == 288
    key = jax.random.PRNGKey(0)
    kx, kparam = jax.random.split(key)
    x = jax.random.normal(kx, (B, T, H), jnp.float32)

    pt_params = init_params(kparam, H, T, LOOKBACK)
    kernel_params = pack_params(pt_params, H)

    out = seq_learn_forward(x, kernel_params)
    out = jax.block_until_ready(out)

    ref = reference_forward(x, pt_params, H)
    # Tolerance sized for bf16 head weights (LSTM + accumulation remain f32).
    np.testing.assert_allclose(np.asarray(out), np.asarray(ref), rtol=2e-2, atol=5e-2)
    assert out.shape == (B, 5) and out.dtype == jnp.float32

    print("KERNEL_OK")
</pallas_src>

<mosaic_0001>
module attributes {stable_mosaic.version = 11 : i64} {
  func.func @seq_learn_kernel(%arg0: memref<8x96xf32, #tpu.memory_space<vmem>>, %arg1: memref<24x32xf32, #tpu.memory_space<vmem>>, %arg2: memref<32x256xf32, #tpu.memory_space<vmem>>, %arg3: memref<64x256xf32, #tpu.memory_space<vmem>>, %arg4: memref<1x256xf32, #tpu.memory_space<vmem>>, %arg5: memref<64x256xf32, #tpu.memory_space<vmem>>, %arg6: memref<64x256xf32, #tpu.memory_space<vmem>>, %arg7: memref<1x256xf32, #tpu.memory_space<vmem>>, %arg8: memref<288x512xbf16, #tpu.memory_space<any>>, %arg9: memref<1x512xf32, #tpu.memory_space<vmem>>, %arg10: memref<512x128xbf16, #tpu.memory_space<any>>, %arg11: memref<1x128xf32, #tpu.memory_space<vmem>>, %arg12: memref<8x128xf32, #tpu.memory_space<vmem>>, %arg13: memref<288x512xbf16, #tpu.memory_space<vmem>>, %arg14: memref<512x128xbf16, #tpu.memory_space<vmem>>, %arg15: memref<2x!tpu.dma_semaphore, #tpu.memory_space<semaphore_mem>>) attributes {dimension_semantics = [], scalar_prefetch = 0 : i64, scratch_operands = 3 : i64, tpu.core_type = #tpu.core_type<tc>} {
    %c0_i32 = arith.constant 0 : i32
    %0 = tpu.memref_slice %arg15[%c0_i32] : memref<2x!tpu.dma_semaphore, #tpu.memory_space<semaphore_mem>> -> memref<1x!tpu.dma_semaphore, #tpu.memory_space<semaphore_mem>>
    %1 = tpu.memref_squeeze %0 : memref<1x!tpu.dma_semaphore, #tpu.memory_space<semaphore_mem>> -> memref<!tpu.dma_semaphore, #tpu.memory_space<semaphore_mem>>
    tpu.enqueue_dma source(%arg8 : memref<288x512xbf16, #tpu.memory_space<any>>) target(%arg13 : memref<288x512xbf16, #tpu.memory_space<vmem>>) target_semaphore(%1 : memref<!tpu.dma_semaphore, #tpu.memory_space<semaphore_mem>>)
    %c1_i32 = arith.constant 1 : i32
    %2 = tpu.memref_slice %arg15[%c1_i32] : memref<2x!tpu.dma_semaphore, #tpu.memory_space<semaphore_mem>> -> memref<1x!tpu.dma_semaphore, #tpu.memory_space<semaphore_mem>>
    %3 = tpu.memref_squeeze %2 : memref<1x!tpu.dma_semaphore, #tpu.memory_space<semaphore_mem>> -> memref<!tpu.dma_semaphore, #tpu.memory_space<semaphore_mem>>
    tpu.enqueue_dma source(%arg10 : memref<512x128xbf16, #tpu.memory_space<any>>) target(%arg14 : memref<512x128xbf16, #tpu.memory_space<vmem>>) target_semaphore(%3 : memref<!tpu.dma_semaphore, #tpu.memory_space<semaphore_mem>>)
    %4 = tpu.iota {dimensions = array<i32: 1>} : vector<1x256xi32>
    %c64_i32 = arith.constant 64 : i32
    %c0_i32_0 = arith.constant 0 : i32
    %5 = arith.cmpi eq, %c64_i32, %c0_i32_0 : i32
    %c1_i32_1 = arith.constant 1 : i32
    %6 = arith.select %5, %c1_i32_1, %c64_i32 : i32
    %7 = vector.broadcast %6 : i32 to vector<1x256xi32>
    %8 = arith.remsi %4, %7 : vector<1x256xi32>
    %c0_i32_2 = arith.constant 0 : i32
    %9 = vector.broadcast %c0_i32_2 : i32 to vector<1x256xi32>
    %10 = arith.cmpi ne, %8, %9 : vector<1x256xi32>
    %c0_i32_3 = arith.constant 0 : i32
    %11 = vector.broadcast %c0_i32_3 : i32 to vector<1x256xi32>
    %12 = arith.cmpi slt, %8, %11 : vector<1x256xi32>
    %c0_i32_4 = arith.constant 0 : i32
    %13 = arith.cmpi slt, %6, %c0_i32_4 : i32
    %14 = vector.broadcast %13 : i1 to vector<1x256xi1>
    %15 = vector.broadcast %14 : vector<1x256xi1> to vector<1x256xi1>
    %16 = arith.xori %12, %15 : vector<1x256xi1>
    %17 = arith.andi %16, %10 : vector<1x256xi1>
    %18 = vector.broadcast %6 : i32 to vector<1x256xi32>
    %19 = arith.addi %8, %18 : vector<1x256xi32>
    %20 = arith.select %17, %19, %8 : vector<1x256xi1>, vector<1x256xi32>
    %c32_i32 = arith.constant 32 : i32
    %21 = vector.broadcast %c32_i32 : i32 to vector<1x256xi32>
    %22 = arith.cmpi slt, %20, %21 : vector<1x256xi32>
    %23 = tpu.iota {dimensions = array<i32: 1>} : vector<1x64xi32>
    %c32_i32_5 = arith.constant 32 : i32
    %24 = vector.broadcast %c32_i32_5 : i32 to vector<1x64xi32>
    %25 = arith.cmpi slt, %23, %24 : vector<1x64xi32>
    %c0 = arith.constant 0 : index
    %c0_6 = arith.constant 0 : index
    %26 = vector.load %arg1[%c0, %c0_6] : memref<24x32xf32, #tpu.memory_space<vmem>>, vector<24x32xf32>
    %c0_7 = arith.constant 0 : index
    %c0_8 = arith.constant 0 : index
    %27 = vector.load %arg2[%c0_7, %c0_8] : memref<32x256xf32, #tpu.memory_space<vmem>>, vector<32x256xf32>
    %cst = arith.constant dense<0.000000e+00> : vector<24x256xf32>
    %28 = tpu.matmul %26, %27, %cst {dimension_numbers = #tpu.dot_dimension_numbers<[1], [0], [0], [1], [0, 0, 1, 1], [], []>} : vector<24x32xf32>, vector<32x256xf32>, vector<24x256xf32> -> vector<24x256xf32>
    %c0_9 = arith.constant 0 : index
    %c0_10 = arith.constant 0 : index
    %29 = vector.load %arg4[%c0_9, %c0_10] : memref<1x256xf32, #tpu.memory_space<vmem>>, vector<1x256xf32>
    %30 = vector.broadcast %29 : vector<1x256xf32> to vector<24x256xf32>
    %31 = arith.addf %28, %30 : vector<24x256xf32>
    %c0_11 = arith.constant 0 : index
    %c0_12 = arith.constant 0 : index
    %32 = vector.load %arg3[%c0_11, %c0_12] : memref<64x256xf32, #tpu.memory_space<vmem>>, vector<64x256xf32>
    %cst_13 = arith.constant 0.000000e+00 : f32
    %33 = vector.broadcast %cst_13 : f32 to vector<8x64xf32>
    %cst_14 = arith.constant 0.000000e+00 : f32
    %34 = vector.broadcast %cst_14 : f32 to vector<8x64xf32>
    %35 = vector.extract_strided_slice %31 {offsets = [0, 0], sizes = [8, 256], strides = [1, 1]} : vector<24x256xf32> to vector<8x256xf32>
    %36 = vector.extract_strided_slice %31 {offsets = [16, 0], sizes = [8, 256], strides = [1, 1]} : vector<24x256xf32> to vector<8x256xf32>
    %37 = vector.shape_cast %22 : vector<1x256xi1> to vector<1x256xi1>
    %38 = vector.broadcast %37 : vector<1x256xi1> to vector<8x256xi1>
    %39 = arith.select %38, %35, %36 : vector<8x256xi1>, vector<8x256xf32>
    %cst_15 = arith.constant dense<0.000000e+00> : vector<8x256xf32>
    %40 = tpu.matmul %33, %32, %cst_15 {dimension_numbers = #tpu.dot_dimension_numbers<[1], [0], [0], [1], [0, 0, 1, 1], [], []>} : vector<8x64xf32>, vector<64x256xf32>, vector<8x256xf32> -> vector<8x256xf32>
    %41 = arith.addf %39, %40 : vector<8x256xf32>
    %42 = vector.extract_strided_slice %41 {offsets = [0, 0], sizes = [8, 192], strides = [1, 1]} : vector<8x256xf32> to vector<8x192xf32>
    %43 = arith.negf %42 : vector<8x192xf32>
    %44 = math.exp %43 : vector<8x192xf32>
    %cst_16 = arith.constant 1.000000e+00 : f32
    %45 = vector.broadcast %cst_16 : f32 to vector<8x192xf32>
    %46 = arith.addf %45, %44 : vector<8x192xf32>
    %47 = arith.divf %45, %46 : vector<8x192xf32>
    %48 = vector.extract_strided_slice %41 {offsets = [0, 192], sizes = [8, 64], strides = [1, 1]} : vector<8x256xf32> to vector<8x64xf32>
    %49 = math.tanh %48 : vector<8x64xf32>
    %50 = vector.extract_strided_slice %47 {offsets = [0, 0], sizes = [8, 64], strides = [1, 1]} : vector<8x192xf32> to vector<8x64xf32>
    %51 = vector.extract_strided_slice %47 {offsets = [0, 64], sizes = [8, 64], strides = [1, 1]} : vector<8x192xf32> to vector<8x64xf32>
    %52 = vector.extract_strided_slice %47 {offsets = [0, 128], sizes = [8, 64], strides = [1, 1]} : vector<8x192xf32> to vector<8x64xf32>
    %53 = arith.mulf %51, %34 : vector<8x64xf32>
    %54 = arith.mulf %50, %49 : vector<8x64xf32>
    %55 = arith.addf %53, %54 : vector<8x64xf32>
    %56 = math.tanh %55 : vector<8x64xf32>
    %57 = arith.mulf %52, %56 : vector<8x64xf32>
    %58 = vector.extract_strided_slice %31 {offsets = [8, 0], sizes = [8, 256], strides = [1, 1]} : vector<24x256xf32> to vector<8x256xf32>
    %cst_17 = arith.constant dense<0.000000e+00> : vector<8x256xf32>
    %59 = tpu.matmul %57, %32, %cst_17 {dimension_numbers = #tpu.dot_dimension_numbers<[1], [0], [0], [1], [0, 0, 1, 1], [], []>} : vector<8x64xf32>, vector<64x256xf32>, vector<8x256xf32> -> vector<8x256xf32>
    %60 = arith.addf %58, %59 : vector<8x256xf32>
    %61 = vector.extract_strided_slice %60 {offsets = [0, 0], sizes = [8, 192], strides = [1, 1]} : vector<8x256xf32> to vector<8x192xf32>
    %62 = arith.negf %61 : vector<8x192xf32>
    %63 = math.exp %62 : vector<8x192xf32>
    %cst_18 = arith.constant 1.000000e+00 : f32
    %64 = vector.broadcast %cst_18 : f32 to vector<8x192xf32>
    %65 = arith.addf %64, %63 : vector<8x192xf32>
    %66 = arith.divf %64, %65 : vector<8x192xf32>
    %67 = vector.extract_strided_slice %60 {offsets = [0, 192], sizes = [8, 64], strides = [1, 1]} : vector<8x256xf32> to vector<8x64xf32>
    %68 = math.tanh %67 : vector<8x64xf32>
    %69 = vector.extract_strided_slice %66 {offsets = [0, 0], sizes = [8, 64], strides = [1, 1]} : vector<8x192xf32> to vector<8x64xf32>
    %70 = vector.extract_strided_slice %66 {offsets = [0, 64], sizes = [8, 64], strides = [1, 1]} : vector<8x192xf32> to vector<8x64xf32>
    %71 = vector.extract_strided_slice %66 {offsets = [0, 128], sizes = [8, 64], strides = [1, 1]} : vector<8x192xf32> to vector<8x64xf32>
    %72 = arith.mulf %70, %55 : vector<8x64xf32>
    %73 = arith.mulf %69, %68 : vector<8x64xf32>
    %74 = arith.addf %72, %73 : vector<8x64xf32>
    %75 = math.tanh %74 : vector<8x64xf32>
    %76 = arith.mulf %71, %75 : vector<8x64xf32>
    %77 = vector.extract_strided_slice %31 {offsets = [16, 0], sizes = [8, 256], strides = [1, 1]} : vector<24x256xf32> to vector<8x256xf32>
    %78 = vector.extract_strided_slice %31 {offsets = [0, 0], sizes = [8, 256], strides = [1, 1]} : vector<24x256xf32> to vector<8x256xf32>
    %79 = vector.shape_cast %22 : vector<1x256xi1> to vector<1x256xi1>
    %80 = vector.broadcast %79 : vector<1x256xi1> to vector<8x256xi1>
    %81 = arith.select %80, %77, %78 : vector<8x256xi1>, vector<8x256xf32>
    %cst_19 = arith.constant dense<0.000000e+00> : vector<8x256xf32>
    %82 = tpu.matmul %76, %32, %cst_19 {dimension_numbers = #tpu.dot_dimension_numbers<[1], [0], [0], [1], [0, 0, 1, 1], [], []>} : vector<8x64xf32>, vector<64x256xf32>, vector<8x256xf32> -> vector<8x256xf32>
    %83 = arith.addf %81, %82 : vector<8x256xf32>
    %84 = vector.extract_strided_slice %83 {offsets = [0, 0], sizes = [8, 192], strides = [1, 1]} : vector<8x256xf32> to vector<8x192xf32>
    %85 = arith.negf %84 : vector<8x192xf32>
    %86 = math.exp %85 : vector<8x192xf32>
    %cst_20 = arith.constant 1.000000e+00 : f32
    %87 = vector.broadcast %cst_20 : f32 to vector<8x192xf32>
    %88 = arith.addf %87, %86 : vector<8x192xf32>
    %89 = arith.divf %87, %88 : vector<8x192xf32>
    %90 = vector.extract_strided_slice %83 {offsets = [0, 192], sizes = [8, 64], strides = [1, 1]} : vector<8x256xf32> to vector<8x64xf32>
    %91 = math.tanh %90 : vector<8x64xf32>
    %92 = vector.extract_strided_slice %89 {offsets = [0, 0], sizes = [8, 64], strides = [1, 1]} : vector<8x192xf32> to vector<8x64xf32>
    %93 = vector.extract_strided_slice %89 {offsets = [0, 64], sizes = [8, 64], strides = [1, 1]} : vector<8x192xf32> to vector<8x64xf32>
    %94 = vector.extract_strided_slice %89 {offsets = [0, 128], sizes = [8, 64], strides = [1, 1]} : vector<8x192xf32> to vector<8x64xf32>
    %95 = arith.mulf %93, %74 : vector<8x64xf32>
    %96 = arith.mulf %92, %91 : vector<8x64xf32>
    %97 = arith.addf %95, %96 : vector<8x64xf32>
    %98 = math.tanh %97 : vector<8x64xf32>
    %99 = arith.mulf %94, %98 : vector<8x64xf32>
    %100 = vector.shape_cast %25 : vector<1x64xi1> to vector<1x64xi1>
    %101 = vector.broadcast %100 : vector<1x64xi1> to vector<8x64xi1>
    %102 = arith.select %101, %57, %99 : vector<8x64xi1>, vector<8x64xf32>
    %103 = vector.shape_cast %25 : vector<1x64xi1> to vector<1x64xi1>
    %104 = vector.broadcast %103 : vector<1x64xi1> to vector<8x64xi1>
    %105 = arith.select %104, %99, %57 : vector<8x64xi1>, vector<8x64xf32>
    %106 = tpu.concatenate %102, %76, %105 in 0 : vector<8x64xf32>, vector<8x64xf32>, vector<8x64xf32> -> vector<24x64xf32>
    %c0_21 = arith.constant 0 : index
    %c0_22 = arith.constant 0 : index
    %107 = vector.load %arg5[%c0_21, %c0_22] : memref<64x256xf32, #tpu.memory_space<vmem>>, vector<64x256xf32>
    %cst_23 = arith.constant dense<0.000000e+00> : vector<24x256xf32>
    %108 = tpu.matmul %106, %107, %cst_23 {dimension_numbers = #tpu.dot_dimension_numbers<[1], [0], [0], [1], [0, 0, 1, 1], [], []>} : vector<24x64xf32>, vector<64x256xf32>, vector<24x256xf32> -> vector<24x256xf32>
    %c0_24 = arith.constant 0 : index
    %c0_25 = arith.constant 0 : index
    %109 = vector.load %arg7[%c0_24, %c0_25] : memref<1x256xf32, #tpu.memory_space<vmem>>, vector<1x256xf32>
    %110 = vector.broadcast %109 : vector<1x256xf32> to vector<24x256xf32>
    %111 = arith.addf %108, %110 : vector<24x256xf32>
    %c0_26 = arith.constant 0 : index
    %c0_27 = arith.constant 0 : index
    %112 = vector.load %arg6[%c0_26, %c0_27] : memref<64x256xf32, #tpu.memory_space<vmem>>, vector<64x256xf32>
    %cst_28 = arith.constant 0.000000e+00 : f32
    %113 = vector.broadcast %cst_28 : f32 to vector<8x64xf32>
    %cst_29 = arith.constant 0.000000e+00 : f32
    %114 = vector.broadcast %cst_29 : f32 to vector<8x64xf32>
    %115 = vector.extract_strided_slice %111 {offsets = [0, 0], sizes = [8, 256], strides = [1, 1]} : vector<24x256xf32> to vector<8x256xf32>
    %116 = vector.extract_strided_slice %111 {offsets = [16, 0], sizes = [8, 256], strides = [1, 1]} : vector<24x256xf32> to vector<8x256xf32>
    %117 = vector.shape_cast %22 : vector<1x256xi1> to vector<1x256xi1>
    %118 = vector.broadcast %117 : vector<1x256xi1> to vector<8x256xi1>
    %119 = arith.select %118, %115, %116 : vector<8x256xi1>, vector<8x256xf32>
    %cst_30 = arith.constant dense<0.000000e+00> : vector<8x256xf32>
    %120 = tpu.matmul %113, %112, %cst_30 {dimension_numbers = #tpu.dot_dimension_numbers<[1], [0], [0], [1], [0, 0, 1, 1], [], []>} : vector<8x64xf32>, vector<64x256xf32>, vector<8x256xf32> -> vector<8x256xf32>
    %121 = arith.addf %119, %120 : vector<8x256xf32>
    %122 = vector.extract_strided_slice %121 {offsets = [0, 0], sizes = [8, 192], strides = [1, 1]} : vector<8x256xf32> to vector<8x192xf32>
    %123 = arith.negf %122 : vector<8x192xf32>
    %124 = math.exp %123 : vector<8x192xf32>
    %cst_31 = arith.constant 1.000000e+00 : f32
    %125 = vector.broadcast %cst_31 : f32 to vector<8x192xf32>
    %126 = arith.addf %125, %124 : vector<8x192xf32>
    %127 = arith.divf %125, %126 : vector<8x192xf32>
    %128 = vector.extract_strided_slice %121 {offsets = [0, 192], sizes = [8, 64], strides = [1, 1]} : vector<8x256xf32> to vector<8x64xf32>
    %129 = math.tanh %128 : vector<8x64xf32>
    %130 = vector.extract_strided_slice %127 {offsets = [0, 0], sizes = [8, 64], strides = [1, 1]} : vector<8x192xf32> to vector<8x64xf32>
    %131 = vector.extract_strided_slice %127 {offsets = [0, 64], sizes = [8, 64], strides = [1, 1]} : vector<8x192xf32> to vector<8x64xf32>
    %132 = vector.extract_strided_slice %127 {offsets = [0, 128], sizes = [8, 64], strides = [1, 1]} : vector<8x192xf32> to vector<8x64xf32>
    %133 = arith.mulf %131, %114 : vector<8x64xf32>
    %134 = arith.mulf %130, %129 : vector<8x64xf32>
    %135 = arith.addf %133, %134 : vector<8x64xf32>
    %136 = math.tanh %135 : vector<8x64xf32>
    %137 = arith.mulf %132, %136 : vector<8x64xf32>
    %138 = vector.extract_strided_slice %111 {offsets = [8, 0], sizes = [8, 256], strides = [1, 1]} : vector<24x256xf32> to vector<8x256xf32>
    %cst_32 = arith.constant dense<0.000000e+00> : vector<8x256xf32>
    %139 = tpu.matmul %137, %112, %cst_32 {dimension_numbers = #tpu.dot_dimension_numbers<[1], [0], [0], [1], [0, 0, 1, 1], [], []>} : vector<8x64xf32>, vector<64x256xf32>, vector<8x256xf32> -> vector<8x256xf32>
    %140 = arith.addf %138, %139 : vector<8x256xf32>
    %141 = vector.extract_strided_slice %140 {offsets = [0, 0], sizes = [8, 192], strides = [1, 1]} : vector<8x256xf32> to vector<8x192xf32>
    %142 = arith.negf %141 : vector<8x192xf32>
    %143 = math.exp %142 : vector<8x192xf32>
    %cst_33 = arith.constant 1.000000e+00 : f32
    %144 = vector.broadcast %cst_33 : f32 to vector<8x192xf32>
    %145 = arith.addf %144, %143 : vector<8x192xf32>
    %146 = arith.divf %144, %145 : vector<8x192xf32>
    %147 = vector.extract_strided_slice %140 {offsets = [0, 192], sizes = [8, 64], strides = [1, 1]} : vector<8x256xf32> to vector<8x64xf32>
    %148 = math.tanh %147 : vector<8x64xf32>
    %149 = vector.extract_strided_slice %146 {offsets = [0, 0], sizes = [8, 64], strides = [1, 1]} : vector<8x192xf32> to vector<8x64xf32>
    %150 = vector.extract_strided_slice %146 {offsets = [0, 64], sizes = [8, 64], strides = [1, 1]} : vector<8x192xf32> to vector<8x64xf32>
    %151 = vector.extract_strided_slice %146 {offsets = [0, 128], sizes = [8, 64], strides = [1, 1]} : vector<8x192xf32> to vector<8x64xf32>
    %152 = arith.mulf %150, %135 : vector<8x64xf32>
    %153 = arith.mulf %149, %148 : vector<8x64xf32>
    %154 = arith.addf %152, %153 : vector<8x64xf32>
    %155 = math.tanh %154 : vector<8x64xf32>
    %156 = arith.mulf %151, %155 : vector<8x64xf32>
    %157 = vector.extract_strided_slice %111 {offsets = [16, 0], sizes = [8, 256], strides = [1, 1]} : vector<24x256xf32> to vector<8x256xf32>
    %158 = vector.extract_strided_slice %111 {offsets = [0, 0], sizes = [8, 256], strides = [1, 1]} : vector<24x256xf32> to vector<8x256xf32>
    %159 = vector.shape_cast %22 : vector<1x256xi1> to vector<1x256xi1>
    %160 = vector.broadcast %159 : vector<1x256xi1> to vector<8x256xi1>
    %161 = arith.select %160, %157, %158 : vector<8x256xi1>, vector<8x256xf32>
    %cst_34 = arith.constant dense<0.000000e+00> : vector<8x256xf32>
    %162 = tpu.matmul %156, %112, %cst_34 {dimension_numbers = #tpu.dot_dimension_numbers<[1], [0], [0], [1], [0, 0, 1, 1], [], []>} : vector<8x64xf32>, vector<64x256xf32>, vector<8x256xf32> -> vector<8x256xf32>
    %163 = arith.addf %161, %162 : vector<8x256xf32>
    %164 = vector.extract_strided_slice %163 {offsets = [0, 0], sizes = [8, 192], strides = [1, 1]} : vector<8x256xf32> to vector<8x192xf32>
    %165 = arith.negf %164 : vector<8x192xf32>
    %166 = math.exp %165 : vector<8x192xf32>
    %cst_35 = arith.constant 1.000000e+00 : f32
    %167 = vector.broadcast %cst_35 : f32 to vector<8x192xf32>
    %168 = arith.addf %167, %166 : vector<8x192xf32>
    %169 = arith.divf %167, %168 : vector<8x192xf32>
    %170 = vector.extract_strided_slice %163 {offsets = [0, 192], sizes = [8, 64], strides = [1, 1]} : vector<8x256xf32> to vector<8x64xf32>
    %171 = math.tanh %170 : vector<8x64xf32>
    %172 = vector.extract_strided_slice %169 {offsets = [0, 0], sizes = [8, 64], strides = [1, 1]} : vector<8x192xf32> to vector<8x64xf32>
    %173 = vector.extract_strided_slice %169 {offsets = [0, 64], sizes = [8, 64], strides = [1, 1]} : vector<8x192xf32> to vector<8x64xf32>
    %174 = vector.extract_strided_slice %169 {offsets = [0, 128], sizes = [8, 64], strides = [1, 1]} : vector<8x192xf32> to vector<8x64xf32>
    %175 = arith.mulf %173, %154 : vector<8x64xf32>
    %176 = arith.mulf %172, %171 : vector<8x64xf32>
    %177 = arith.addf %175, %176 : vector<8x64xf32>
    %178 = math.tanh %177 : vector<8x64xf32>
    %179 = arith.mulf %174, %178 : vector<8x64xf32>
    %180 = vector.shape_cast %25 : vector<1x64xi1> to vector<1x64xi1>
    %181 = vector.broadcast %180 : vector<1x64xi1> to vector<8x64xi1>
    %182 = arith.select %181, %137, %179 : vector<8x64xi1>, vector<8x64xf32>
    %183 = vector.shape_cast %25 : vector<1x64xi1> to vector<1x64xi1>
    %184 = vector.broadcast %183 : vector<1x64xi1> to vector<8x64xi1>
    %185 = arith.select %184, %179, %137 : vector<8x64xi1>, vector<8x64xf32>
    %c0_36 = arith.constant 0 : index
    %c0_37 = arith.constant 0 : index
    %186 = vector.load %arg0[%c0_36, %c0_37] : memref<8x96xf32, #tpu.memory_space<vmem>>, vector<8x96xf32>
    %187 = tpu.concatenate %186, %182, %156, %185 in 1 : vector<8x96xf32>, vector<8x64xf32>, vector<8x64xf32>, vector<8x64xf32> -> vector<8x288xf32>
    %c0_i32_38 = arith.constant 0 : i32
    %188 = tpu.memref_slice %arg15[%c0_i32_38] : memref<2x!tpu.dma_semaphore, #tpu.memory_space<semaphore_mem>> -> memref<1x!tpu.dma_semaphore, #tpu.memory_space<semaphore_mem>>
    %189 = tpu.memref_squeeze %188 : memref<1x!tpu.dma_semaphore, #tpu.memory_space<semaphore_mem>> -> memref<!tpu.dma_semaphore, #tpu.memory_space<semaphore_mem>>
    tpu.wait_dma2 semaphore(%189 : memref<!tpu.dma_semaphore, #tpu.memory_space<semaphore_mem>>) src(%arg8 : memref<288x512xbf16, #tpu.memory_space<any>>) dst(%arg13 : memref<288x512xbf16, #tpu.memory_space<vmem>>)
    %190 = arith.truncf %187 : vector<8x288xf32> to vector<8x288xbf16>
    %c0_39 = arith.constant 0 : index
    %c0_40 = arith.constant 0 : index
    %191 = vector.load %arg13[%c0_39, %c0_40] : memref<288x512xbf16, #tpu.memory_space<vmem>>, vector<288x512xbf16>
    %cst_41 = arith.constant dense<0.000000e+00> : vector<8x512xf32>
    %192 = tpu.matmul %190, %191, %cst_41 {dimension_numbers = #tpu.dot_dimension_numbers<[1], [0], [0], [1], [0, 0, 1, 1], [], []>} : vector<8x288xbf16>, vector<288x512xbf16>, vector<8x512xf32> -> vector<8x512xf32>
    %c0_42 = arith.constant 0 : index
    %c0_43 = arith.constant 0 : index
    %193 = vector.load %arg9[%c0_42, %c0_43] : memref<1x512xf32, #tpu.memory_space<vmem>>, vector<1x512xf32>
    %194 = vector.broadcast %193 : vector<1x512xf32> to vector<8x512xf32>
    %195 = arith.addf %192, %194 : vector<8x512xf32>
    %cst_44 = arith.constant 0.000000e+00 : f32
    %196 = vector.broadcast %cst_44 : f32 to vector<8x512xf32>
    %197 = arith.maximumf %195, %196 : vector<8x512xf32>
    %c1_i32_45 = arith.constant 1 : i32
    %198 = tpu.memref_slice %arg15[%c1_i32_45] : memref<2x!tpu.dma_semaphore, #tpu.memory_space<semaphore_mem>> -> memref<1x!tpu.dma_semaphore, #tpu.memory_space<semaphore_mem>>
    %199 = tpu.memref_squeeze %198 : memref<1x!tpu.dma_semaphore, #tpu.memory_space<semaphore_mem>> -> memref<!tpu.dma_semaphore, #tpu.memory_space<semaphore_mem>>
    tpu.wait_dma2 semaphore(%199 : memref<!tpu.dma_semaphore, #tpu.memory_space<semaphore_mem>>) src(%arg10 : memref<512x128xbf16, #tpu.memory_space<any>>) dst(%arg14 : memref<512x128xbf16, #tpu.memory_space<vmem>>)
    %200 = arith.truncf %197 : vector<8x512xf32> to vector<8x512xbf16>
    %c0_46 = arith.constant 0 : index
    %c0_47 = arith.constant 0 : index
    %201 = vector.load %arg14[%c0_46, %c0_47] : memref<512x128xbf16, #tpu.memory_space<vmem>>, vector<512x128xbf16>
    %cst_48 = arith.constant dense<0.000000e+00> : vector<8x128xf32>
    %202 = tpu.matmul %200, %201, %cst_48 {dimension_numbers = #tpu.dot_dimension_numbers<[1], [0], [0], [1], [0, 0, 1, 1], [], []>} : vector<8x512xbf16>, vector<512x128xbf16>, vector<8x128xf32> -> vector<8x128xf32>
    %c0_49 = arith.constant 0 : index
    %c0_50 = arith.constant 0 : index
    %203 = vector.load %arg11[%c0_49, %c0_50] : memref<1x128xf32, #tpu.memory_space<vmem>>, vector<1x128xf32>
    %204 = vector.broadcast %203 : vector<1x128xf32> to vector<8x128xf32>
    %205 = arith.addf %202, %204 : vector<8x128xf32>
    %c0_51 = arith.constant 0 : index
    %c0_52 = arith.constant 0 : index
    %206 = vector.load %arg12[%c0_51, %c0_52] : memref<8x128xf32, #tpu.memory_space<vmem>>, vector<8x128xf32>
    tpu.vector_store %arg12[%c0_51, %c0_52], %205 {strides = array<i32>} : memref<8x128xf32, #tpu.memory_space<vmem>>, vector<8x128xf32>,
    return
  }
}

</mosaic_0001>

<bundles_post_ra>
// kernel: tpu_custom_call.1
= control target key start
LH: loop header
LB: loop body
LE: loop exit
PB: predicated region body
PF: predicated region fallthrough
CT: control target
= control target key end

     0   :  { %17 = vsyncpa [#allocation6], 0  ;;  %s3077_s0 = inlined_call_operand.hbm [shape: f32[8,96], index: 0, kind: input, shape index: {}]   ;;  %s3078_s1 = inlined_call_operand.hbm [shape: f32[24,32], index: 1, kind: input, shape index: {}]   ;;  %s3079_s2 = inlined_call_operand.hbm [shape: f32[32,256], index: 2, kind: input, shape index: {}]   ;;  %s3080_s3 = inlined_call_operand.hbm [shape: f32[64,256], index: 3, kind: input, shape index: {}]   ;;  %s3081_s4 = inlined_call_operand.vmem [shape: f32[1,256], index: 4, kind: input, shape index: {}]   ;;  %s3082_s5 = inlined_call_operand.hbm [shape: f32[64,256], index: 5, kind: input, shape index: {}]   ;;  %s3083_s6 = inlined_call_operand.hbm [shape: f32[64,256], index: 6, kind: input, shape index: {}]   ;;  %s3084_s7 = inlined_call_operand.vmem [shape: f32[1,256], index: 7, kind: input, shape index: {}]   ;;  %s3085_s8 = inlined_call_operand.hbm [shape: bf16[288,512], index: 8, kind: input, shape index: {}]   ;;  %s3086_s9 = inlined_call_operand.vmem [shape: f32[1,512], index: 9, kind: input, shape index: {}]   ;;  %s3087_s10 = inlined_call_operand.hbm [shape: bf16[512,128], index: 10, kind: input, shape index: {}]   ;;  %s3088_s11 = inlined_call_operand.vmem [shape: f32[1,128], index: 11, kind: input, shape index: {}]   ;;  %s3089_s12 = inlined_call_operand.hbm [shape: f32[8,128], index: 12, kind: output, shape index: {}]  }
   0x1   :  { %18 = vsyncpa [#allocation9], 0 }
   0x2   :  { %19 = vsyncpa [#allocation12], 0 }
   0x3   :  { %20 = vsyncpa [#allocation15], 0 }
   0x4   :  { %21 = vsyncpa [#allocation7], 0  ;;  %s2724_s21 = smov [#allocation8]  }
   0x5   :  { %s37_s22 = sshll.u32 %s2724_s21, 4  ;;  %s38_s22 = int_to_ptr.vmem [resolvable:$true] %s37_s22 }
   0x6   :  { %s2538_s23 = scalar_lea.vmem %s38_s22, 384  ;;  %p2543_p1 = scmp.lt.s32.totalorder %s38_s22, %s38_s22 }
   0x7   :  { %p2539_p0 = scmp.ne.s32.totalorder %s38_s22, %s2538_s23  ;;  %p2544_p2 = scmp.lt.s32.totalorder %s2538_s23, %s2538_s23 }
   0x9   :  { %p2545_p3 = por %p2544_p2, %p2543_p1 }
   0xb   :  { %p2546_p4 = pnand %p2545_p3, %p2539_p0 }
   0xd   :  { %2549 = shalt.err (!%p2546_p4)
}
   0xe   :  { %s2725_s24 = smov 128   ;;  %s2726_s25 = smov 8  }
   0xf   :  { %43 = dma.hbm_to_vmem [thread:$0]  %s3078_s1, 384, %s38_s22, [#allocation9], %s2725_s24, %s2725_s24, %s2726_s25  }
  0x10   :  { %s2727_s28 = smov [#allocation11]   ;;  %s2728_s30 = smov [#allocation5]  }
  0x11   :  { %s61_s29 = sshll.u32 %s2727_s28, 4  ;;  %s28_s13 = sshll.u32 %s2728_s30, 4  ;;  %s62_s29 = int_to_ptr.vmem [resolvable:$true] %s61_s29  ;;  %s29_s13 = int_to_ptr.vmem [resolvable:$true] %s28_s13 }
  0x12   :  { %s2558_s14 = scalar_lea.vmem %s62_s29, 2048  ;;  %p2563_p6 = scmp.lt.s32.totalorder %s62_s29, %s62_s29 }
  0x13   :  { %p2559_p5 = scmp.ne.s32.totalorder %s62_s29, %s2558_s14  ;;  %p2564_p7 = scmp.lt.s32.totalorder %s2558_s14, %s2558_s14 }
  0x15   :  { %p2565_p8 = por %p2564_p7, %p2563_p6 }
  0x17   :  { %p2566_p9 = pnand %p2565_p8, %p2559_p5 }
  0x19   :  { %2569 = shalt.err (!%p2566_p9)
}
  0x1a   :  { %s2729_s15 = smov 256   ;;  %s2730_s16 = smov 16  }
  0x1b   :  { %67 = dma.hbm_to_vmem [thread:$0]  %s3080_s3, 2048, %s62_s29, [#allocation12], %s2729_s15, %s2729_s15, %s2730_s16  }
  0x1c   :  { %s2578_s1 = scalar_lea.vmem %s29_s13, 128  ;;  %p2583_p11 = scmp.lt.s32.totalorder %s29_s13, %s29_s13 }
  0x1d   :  { %p2579_p10 = scmp.ne.s32.totalorder %s29_s13, %s2578_s1  ;;  %p2584_p12 = scmp.lt.s32.totalorder %s2578_s1, %s2578_s1 }
  0x1f   :  { %p2585_p13 = por %p2584_p12, %p2583_p11 }
  0x21   :  { %p2586_p0 = pnand %p2585_p13, %p2579_p10 }
  0x23   :  { %2589 = shalt.err (!%p2586_p0)
}
  0x24   :  { %31 = dma.hbm_to_vmem [thread:$0]  %s3077_s0, 128, %s29_s13, [#allocation6]  }
  0x25   :  { %s2731_s21 = smov [#allocation10]   ;;  %s2732_s23 = smov [#allocation13]  }
  0x26   :  { %s49_s22 = sshll.u32 %s2731_s21, 4  ;;  %s75_s24 = sshll.u32 %s2732_s23, 4  ;;  %s50_s22 = int_to_ptr.vmem [resolvable:$true] %s49_s22  ;;  %s76_s24 = int_to_ptr.vmem [resolvable:$true] %s75_s24 }
  0x27   :  { %s2598_s25 = scalar_lea.vmem %s50_s22, 1024  ;;  %p2603_p2 = scmp.lt.s32.totalorder %s50_s22, %s50_s22 }
  0x28   :  { %p2599_p1 = scmp.ne.s32.totalorder %s50_s22, %s2598_s25  ;;  %p2604_p3 = scmp.lt.s32.totalorder %s2598_s25, %s2598_s25 }
  0x2a   :  { %p2605_p4 = por %p2604_p3, %p2603_p2 }
  0x2c   :  { %p2606_p5 = pnand %p2605_p4, %p2599_p1 }
  0x2e   :  { %2609 = shalt.err (!%p2606_p5)
}
  0x2f   :  { %55 = dma.hbm_to_vmem [thread:$0]  %s3079_s2, 1024, %s50_s22, [#allocation9], %s2729_s15, %s2729_s15, %s2730_s16  }
  0x30   :  { %s2618_s0 = scalar_lea.vmem %s76_s24, 2048  ;;  %p2623_p7 = scmp.lt.s32.totalorder %s76_s24, %s76_s24 }
  0x31   :  { %p2619_p6 = scmp.ne.s32.totalorder %s76_s24, %s2618_s0  ;;  %p2624_p8 = scmp.lt.s32.totalorder %s2618_s0, %s2618_s0 }
  0x33   :  { %p2625_p9 = por %p2624_p8, %p2623_p7 }
  0x35   :  { %p2626_p10 = pnand %p2625_p9, %p2619_p6 }
  0x37   :  { %2629 = shalt.err (!%p2626_p10)
}
  0x38   :  { %81 = dma.hbm_to_vmem [thread:$0]  %s3082_s5, 2048, %s76_s24, [#allocation12], %s2729_s15, %s2729_s15, %s2730_s16  }
  0x39   :  { %s2733_s29 = smov [#allocation14]  }
  0x3a   :  { %s87_s30 = sshll.u32 %s2733_s29, 4  ;;  %s88_s30 = int_to_ptr.vmem [resolvable:$true] %s87_s30 }
  0x3b   :  { %s2638_s13 = scalar_lea.vmem %s88_s30, 2048  ;;  %p2643_p12 = scmp.lt.s32.totalorder %s88_s30, %s88_s30 }
  0x3c   :  { %p2639_p11 = scmp.ne.s32.totalorder %s88_s30, %s2638_s13  ;;  %p2644_p13 = scmp.lt.s32.totalorder %s2638_s13, %s2638_s13 }
  0x3e   :  { %p2645_p0 = por %p2644_p13, %p2643_p12 }
  0x40   :  { %p2646_p1 = pnand %p2645_p0, %p2639_p11 }
  0x42   :  { %2649 = shalt.err (!%p2646_p1)
}
  0x43   :  { %93 = dma.hbm_to_vmem [thread:$0]  %s3083_s6, 2048, %s88_s30, [#allocation15], %s2729_s15, %s2729_s15, %s2730_s16  }
  0x44   :  { %2710 = dma.done.wait [#allocation6], 128  }
  0x45   :  { %2711 = vsyncadd [#allocation6], 4294967168 }
  0x46   :  { %2712 = dma.done.wait [#allocation9], 1408  }
  0x47   :  { %2713 = vsyncadd [#allocation9], 4294965888 }
  0x48   :  { %2714 = dma.done.wait [#allocation12], 4096  }
  0x49   :  { %2715 = vsyncadd [#allocation12], 4294963200 }
  0x4a   :  { %2716 = dma.done.wait [#allocation15], 2048  }
  0x4b   :  { %2717 = vsyncadd [#allocation15], 4294965248  ;;  %v2734_v0 = vmov 0.0   ;;  %v182_v1 = vld [vmem:[#allocation10 + $0x38] sm:$0xff]  ;;  %v181_v2 = vld [vmem:[#allocation10 + $0x30] sm:$0xff]  ;;  %vm195_vm0 = vcmask 261120   ;;  %v142_v28 = vlaneseq }
  0x4c   :  { %269 = vmatprep.mubr.f32.mxu0 %v2734_v0  ;;  %378 = vmatprep.mubr.f32.mxu1 %v2734_v0  ;;  %v303_v3 = vld [vmem:[#allocation11 + $0x78] sm:$0xff]  ;;  %v180_v4 = vld [vmem:[#allocation10 + $0x28] sm:$0xff]  ;;  %v302_v5 = vld [vmem:[#allocation11 + $0x70] sm:$0xff]  ;;  %vm310_vm3 = vcmask 523264   ;;  %s2737_s17 = smov [#allocation2]   ;;  %s2738_s1 = smov [#allocation3]  }
  0x4d   :  { %229 = vmatprep.subr.mxu0 %v182_v1  ;;  %330 = vmatprep.subr.mxu1 %v303_v3  ;;  %v179_v6 = vld [vmem:[#allocation10 + $0x20] sm:$0xff]  ;;  %v301_v7 = vld [vmem:[#allocation11 + $0x68] sm:$0xff]  ;;  %v178_v8 = vld [vmem:[#allocation10 + $0x18] sm:$0xff]  ;;  %v2847_v29 = vshrl.u32 %v142_v28, 7  ;;  %v2856_v33 = vand.u32 127, %v142_v28  ;;  %s126_s18 = sshll.u32 %s2737_s17, 4  ;;  %s127_s18 = int_to_ptr.vmem [resolvable:$true] %s126_s18 }
  0x4e   :  { %230 = vmatpush1.msra.mxu0 %v181_v2  ;;  %331 = vmatpush1.msra.mxu1 %v302_v5  ;;  %v300_v9 = vld [vmem:[#allocation11 + $0x60] sm:$0xff]  ;;  %v177_v10 = vld [vmem:[#allocation10 + $0x10] sm:$0xff]  ;;  %v299_v11 = vld [vmem:[#allocation11 + $0x58] sm:$0xff]  ;;  %s138_s19 = sshll.u32 %s2738_s1, 4  ;;  %s2658_s20 = scalar_lea.vmem %s127_s18, 9216  ;;  %s139_s19 = int_to_ptr.vmem [resolvable:$true] %s138_s19 }
  0x4f   :  { %231 = vmatprep.subr.mxu0 %v180_v4  ;;  %332 = vmatprep.subr.mxu1 %v301_v7  ;;  %v176_v12 = vld [vmem:[#allocation10 + $0x8] sm:$0xff]  ;;  %v298_v13 = vld [vmem:[#allocation11 + $0x50] sm:$0xff]  ;;  %v175_v15 = vld [vmem:[#allocation10] sm:$0xff]  ;;  %v2850_v30 = vsub.s32 0, %v2847_v29  ;;  %v2861_v36 = vsub.s32 1, %v2847_v29  ;;  %v144_v38 = vadd.s32 128, %v2856_v33  ;;  %p2659_p2 = scmp.ne.s32.totalorder %s127_s18, %s2658_s20  ;;  %p2663_p3 = scmp.lt.s32.totalorder %s127_s18, %s127_s18 }
  0x50   :  { %232 = vmatpush1.msra.mxu0 %v179_v6  ;;  %333 = vmatpush1.msra.mxu1 %v300_v9  ;;  %v297_v14 = vld [vmem:[#allocation11 + $0x48] sm:$0xff]  ;;  %v296_v16 = vld [vmem:[#allocation11 + $0x40] sm:$0xff]  ;;  %v295_v18 = vld [vmem:[#allocation11 + $0x38] sm:$0xff]  ;;  %v149_v40 = vand.u32 63, %v2856_v33  ;;  %vm171_vm4 = vcmp.lt.s32.totalorder %v2856_v33, 32  ;;  %p2664_p4 = scmp.lt.s32.totalorder %s2658_s20, %s2658_s20 }
  0x51   :  { %233 = vmatprep.subr.mxu0 %v178_v8  ;;  %334 = vmatprep.subr.mxu1 %v299_v11  ;;  %v172_v17 = vld [vmem:[#allocation8] sm:$0xff]  ;;  %v294_v19 = vld [vmem:[#allocation11 + $0x30] sm:$0xff]  ;;  %v292_v21 = vld [vmem:[#allocation11 + $0x20] sm:$0xff]  ;;  %v156_v44 = vand.u32 63, %v144_v38 }
  0x52   :  { %234 = vmatpush1.msra.mxu0 %v177_v10  ;;  %335 = vmatpush1.msra.mxu1 %v298_v13  ;;  %v293_v20 = vld [vmem:[#allocation11 + $0x28] sm:$0xff]  ;;  %v173_v22 = vld [vmem:[#allocation8 + $0x8] sm:$0xff]  ;;  %v291_v23 = vld [vmem:[#allocation11 + $0x18] sm:$0xff]  ;;  %vm2866_vm1 = vcmp.lt.s32.totalorder %v149_v40, 32  ;;  %p2665_p5 = por %p2664_p4, %p2663_p3 }
  0x53   :  { %235 = vmatprep.subr.mxu0 %v176_v12  ;;  %336 = vmatprep.subr.mxu1 %v297_v14  ;;  %v290_v24 = vld [vmem:[#allocation11 + $0x10] sm:$0xff]  ;;  %v289_v25 = vld [vmem:[#allocation11 + $0x8] sm:$0xff]  ;;  %v288_v26 = vld [vmem:[#allocation11] sm:$0xff]  ;;  %vm2872_vm2 = vcmp.lt.s32.totalorder %v156_v44, 32 }
  0x54   :  { %236 = vmatpush1.msra.mxu0 %v175_v15  ;;  %337 = vmatpush1.msra.mxu1 %v296_v16  ;;  %v174_v27 = vld [vmem:[#allocation8 + $0x10] sm:$0xff]  ;;  %v183_v31 = vld [vmem:[%s3081_s4] sm:$0x3]  ;;  %s2735_s4 = smov 64   ;;  %p2666_p6 = pnand %p2665_p5, %p2659_p2 }
  0x55   :  { %2120 = vmatmul.mubr.msk.f32.vlgmr.msra.gmra.mxu0 %vm195_vm0, %v172_v17  ;;  %338 = vmatprep.subr.mxu1 %v295_v18  ;;  %v188_v32 = vrot.slane %v183_v31, %v2850_v30  ;;  %v192_v41 = vrot.slane %v183_v31, %v2861_v36 }
  0x56   :  { %339 = vmatpush1.msra.mxu1 %v294_v19  ;;  %275 = vmatprep.mubr.f32.mxu0 %v2734_v0 }
  0x57   :  { %340 = vmatprep.subr.mxu1 %v293_v20  ;;  %436 = vmatprep.subr.mxu0 %v303_v3 }
  0x58   :  { %341 = vmatpush1.msra.mxu1 %v292_v21  ;;  %437 = vmatpush1.msra.mxu0 %v302_v5 }
  0x59   :  { %2121 = vmatmul.mubr.msk.f32.gmra.mxu0 %vm195_vm0, %v173_v22  ;;  %342 = vmatprep.subr.mxu1 %v291_v23 }
  0x5a   :  { %343 = vmatpush1.msra.mxu1 %v290_v24  ;;  %281 = vmatprep.mubr.f32.mxu0 %v2734_v0 }
  0x5b   :  { %344 = vmatprep.subr.mxu1 %v289_v25  ;;  %438 = vmatprep.subr.mxu0 %v301_v7 }
  0x5c   :  { %345 = vmatpush1.msra.mxu1 %v288_v26  ;;  %439 = vmatpush1.msra.mxu0 %v300_v9 }
  0x5d   :  { %2122 = vmatmul.mubr.msk.f32.gmra.mxu0 %vm195_vm0, %v174_v27  ;;  %379 = vmatmul.mubr.f32.vlgmr.msra.gmra.mxu1 %v2734_v0 }
  0x5e   :  { %440 = vmatprep.subr.mxu0 %v299_v11  ;;  %484 = vmatprep.mubr.f32.mxu0 %v2734_v0 }
  0x5f   :  { %441 = vmatpush1.msra.mxu0 %v298_v13  ;;  %544 = vmatprep.subr.mxu1 %v303_v3 }
  0x60   :  { %442 = vmatprep.subr.mxu0 %v297_v14  ;;  %545 = vmatpush1.msra.mxu1 %v302_v5 }
  0x61   :  { %443 = vmatpush1.msra.mxu0 %v296_v16  ;;  %546 = vmatprep.subr.mxu1 %v301_v7 }
  0x62   :  { %444 = vmatprep.subr.mxu0 %v295_v18  ;;  %547 = vmatpush1.msra.mxu1 %v300_v9 }
  0x63   :  { %445 = vmatpush1.msra.mxu0 %v294_v19  ;;  %548 = vmatprep.subr.mxu1 %v299_v11 }
  0x64   :  { %446 = vmatprep.subr.mxu0 %v293_v20  ;;  %549 = vmatpush1.msra.mxu1 %v298_v13 }
  0x65   :  { %447 = vmatpush1.msra.mxu0 %v292_v21  ;;  %550 = vmatprep.subr.mxu1 %v297_v14 }
  0x66   :  { %448 = vmatprep.subr.mxu0 %v291_v23  ;;  %551 = vmatpush1.msra.mxu1 %v296_v16 }
  0x67   :  { %449 = vmatpush1.msra.mxu0 %v290_v24  ;;  %552 = vmatprep.subr.mxu1 %v295_v18 }
  0x68   :  { %450 = vmatprep.subr.mxu0 %v289_v25  ;;  %553 = vmatpush1.msra.mxu1 %v294_v19 }
  0x69   :  { %451 = vmatpush1.msra.mxu0 %v288_v26  ;;  %554 = vmatprep.subr.mxu1 %v293_v20 }
  0x6a   :  { %555 = vmatpush1.msra.mxu1 %v292_v21  ;;  %592 = vmatprep.mubr.f32.mxu1 %v2734_v0 }
  0x6b   :  { %556 = vmatprep.subr.mxu1 %v291_v23 }
  0x6c   :  { %557 = vmatpush1.msra.mxu1 %v290_v24 }
  0x6d   :  { %558 = vmatprep.subr.mxu1 %v289_v25 }
  0x6e   :  { %559 = vmatpush1.msra.mxu1 %v288_v26 }
 0x115   :  { %v271_v34 = vpop.f32.mrf.mxu0 }
 0x116   :  { %v2858_v35 = vadd.f32 %v271_v34, %v188_v32 }
 0x117   :  { %v273_v37 = vpop.f32.mrf.mxu0 }
 0x118   :  { %v2876_v52 = vadd.f32 %v273_v37, %v192_v41 }
 0x119   :  { %v277_v39 = vpop.f32.mrf.mxu0 }
 0x11a   :  { %v278_v42 = vadd.f32 %v277_v39, %v188_v32 }
 0x11b   :  { %v279_v43 = vpop.f32.mrf.mxu0 }
 0x11c   :  { %v280_v45 = vadd.f32 %v279_v43, %v192_v41 }
 0x11d   :  { %v283_v46 = vpop.f32.mrf.mxu0  ;;  %v380_v49 = vpop.f32.mrf.mxu1 }
 0x11e   :  { %v2870_v48 = vadd.f32 %v283_v46, %v188_v32 }
 0x11f   :  { %v285_v50 = vpop.f32.mrf.mxu0  ;;  %v382_v58 = vpop.f32.mrf.mxu1 }
 0x120   :  { %v308_v53 = vsel %vm2866_vm1, %v2858_v35, %v2870_v48  ;;  %v2882_v54 = vadd.f32 %v285_v50, %v192_v41  ;;  %v523_v55 = vsel %vm2866_vm1, %v2870_v48, %v2858_v35 }
 0x121   :  { %v385_v56 = vadd.f32 %v380_v49, %v308_v53 }
 0x122   :  { %v309_v57 = vsel %vm2872_vm2, %v2876_v52, %v2882_v54  ;;  %v524_v59 = vsel %vm2872_vm2, %v2882_v54, %v2876_v52  ;;  %v648_v52 = vld [vmem:[#allocation13 + $0x68] sm:$0xff]  ;;  %v647_v54 = vld [vmem:[#allocation13 + $0x60] sm:$0xff] }
 0x123   :  { %v386_v60 = vadd.f32 %v382_v58, %v309_v57  ;;  %v2123_v62 = vmul.f32 -1.442695, %v385_v56  ;;  %v649_v56 = vld [vmem:[#allocation13 + $0x70] sm:$0xff]  ;;  %v646_v57 = vld [vmem:[#allocation13 + $0x58] sm:$0xff] }
 0x124   :  { %v645_v58 = vld [vmem:[#allocation13 + $0x50] sm:$0xff] }
 0x125   :  { %2318 = vtanh.f32 %v386_v60  ;;  %v2124_v9 = vmul.f32 -1.442695, %v386_v60  ;;  %v644_v60 = vld [vmem:[#allocation13 + $0x48] sm:$0xff] }
 0x126   :  { %2320 = vpow2.f32 %v2123_v62  ;;  %v2932_v62 = vld [vmem:[#allocation14 + $0x68] sm:$0xff] }
 0x132   :  { %v2319_v61 = vpop.eup %2318 }
 0x133   :  { %402 = vrot.lane.b32.xlu0 %v2319_v61, %s2735_s4  ;;  %v2321_v63 = vpop.eup %2320  ;;  %v2930_v61 = vld [vmem:[#allocation14 + $0x70] sm:$0xff] }
 0x134   :  { %v393_v1 = vadd.f32 1.0, %v2321_v63  ;;  %v643_v63 = vld [vmem:[#allocation13 + $0x40] sm:$0xff] }
 0x136   :  { %2322 = vrcp.f32 %v393_v1  ;;  %v2935_v1 = vld [vmem:[#allocation14 + $0x60] sm:$0xff] }
 0x143   :  { %v2323_v2 = vpop.eup %2322 }
 0x144   :  { %v400_v5 = vmul.f32 0.0, %v2323_v2 }
 0x1a5   :  { %v403_v3 = vpop.permute.xlu0 %402 }
 0x1a6   :  { %v405_v4 = vmul.f32 %v2323_v2, %v403_v3  ;;  %v642_v2 = vld [vmem:[#allocation13 + $0x38] sm:$0xff]  ;;  %v641_v3 = vld [vmem:[#allocation13 + $0x30] sm:$0xff] }
 0x1a8   :  { %407 = vrot.lane.b32.xlu0 %v405_v4, %s2735_s4  ;;  %v640_v4 = vld [vmem:[#allocation13 + $0x28] sm:$0xff] }
 0x21a   :  { %v408_v6 = vpop.permute.xlu0 %407 }
 0x21b   :  { %v410_v7 = vadd.f32 %v408_v6, %v400_v5  ;;  %v639_v5 = vld [vmem:[#allocation13 + $0x20] sm:$0xff]  ;;  %v638_v6 = vld [vmem:[#allocation13 + $0x18] sm:$0xff] }
 0x21d   :  { %2324 = vtanh.f32 %v410_v7 }
 0x21e   :  { %2326 = vpow2.f32 %v2124_v9 }
 0x22a   :  { %v2325_v8 = vpop.eup %2324 }
 0x22b   :  { %413 = vrot.lane.b32.xlu1 %v2325_v8, %s2735_s4  ;;  %v2327_v10 = vpop.eup %2326 }
 0x22c   :  { %v394_v11 = vadd.f32 1.0, %v2327_v10  ;;  %v637_v10 = vld [vmem:[#allocation13 + $0x10] sm:$0xff] }
 0x22e   :  { %2328 = vrcp.f32 %v394_v11  ;;  %v2940_v11 = vld [vmem:[#allocation14 + $0x58] sm:$0xff] }
 0x23b   :  { %v2329_v12 = vpop.eup %2328 }
 0x29d   :  { %v414_v13 = vpop.permute.xlu1 %413 }
 0x29e   :  { %v2899_v14 = vmul.f32 %v2329_v12, %v414_v13  ;;  %v636_v12 = vld [vmem:[#allocation13 + $0x8] sm:$0xff]  ;;  %v2943_v13 = vld [vmem:[#allocation14 + $0x50] sm:$0xff] }
 0x2a0   :  { %2125 = vmatmul.mubr.msk.f32.vlgmr.msra.gmra.mxu0 %vm310_vm3, %v2899_v14 }
 0x2a1   :  { %733 = vmatprep.mubr.f32.mxu0 %v2734_v0 }
 0x360   :  { %v486_v15 = vpop.f32.mrf.mxu0 }
 0x361   :  { %v491_v16 = vadd.f32 %v486_v15, %v278_v42  ;;  %v635_v15 = vld [vmem:[#allocation13] sm:$0xff] }
 0x362   :  { %v488_v17 = vpop.f32.mrf.mxu0 }
 0x363   :  { %v492_v18 = vadd.f32 %v488_v17, %v280_v45  ;;  %v2126_v20 = vmul.f32 -1.442695, %v491_v16  ;;  %v761_v16 = vld [vmem:[#allocation14 + $0x48] sm:$0xff]  ;;  %v760_v17 = vld [vmem:[#allocation14 + $0x40] sm:$0xff] }
 0x365   :  { %2330 = vtanh.f32 %v492_v18  ;;  %v2127_v32 = vmul.f32 -1.442695, %v492_v18  ;;  %v759_v18 = vld [vmem:[#allocation14 + $0x38] sm:$0xff] }
 0x366   :  { %2332 = vpow2.f32 %v2126_v20  ;;  %v757_v20 = vld [vmem:[#allocation14 + $0x28] sm:$0xff] }
 0x372   :  { %v2331_v19 = vpop.eup %2330 }
 0x373   :  { %508 = vrot.lane.b32.xlu1 %v2331_v19, %s2735_s4  ;;  %v2333_v21 = vpop.eup %2332  ;;  %v758_v19 = vld [vmem:[#allocation14 + $0x30] sm:$0xff] }
 0x374   :  { %v499_v22 = vadd.f32 1.0, %v2333_v21  ;;  %v756_v21 = vld [vmem:[#allocation14 + $0x20] sm:$0xff] }
 0x376   :  { %2334 = vrcp.f32 %v499_v22  ;;  %v755_v22 = vld [vmem:[#allocation14 + $0x18] sm:$0xff] }
 0x383   :  { %v2335_v23 = vpop.eup %2334 }
 0x384   :  { %v506_v26 = vmul.f32 %v2335_v23, %v410_v7 }
 0x3e5   :  { %v509_v24 = vpop.permute.xlu1 %508 }
 0x3e6   :  { %v511_v25 = vmul.f32 %v2335_v23, %v509_v24  ;;  %v754_v23 = vld [vmem:[#allocation14 + $0x10] sm:$0xff]  ;;  %v753_v24 = vld [vmem:[#allocation14 + $0x8] sm:$0xff] }
 0x3e8   :  { %513 = vrot.lane.b32.xlu0 %v511_v25, %s2735_s4  ;;  %v752_v25 = vld [vmem:[#allocation14] sm:$0xff] }
 0x45a   :  { %v514_v27 = vpop.permute.xlu0 %513 }
 0x45b   :  { %v2906_v28 = vadd.f32 %v514_v27, %v506_v26 }
 0x45d   :  { %2336 = vtanh.f32 %v2906_v28 }
 0x45e   :  { %2338 = vpow2.f32 %v2127_v32 }
 0x46a   :  { %v2337_v31 = vpop.eup %2336 }
 0x46b   :  { %519 = vrot.lane.b32.xlu1 %v2337_v31, %s2735_s4  ;;  %v2339_v34 = vpop.eup %2338 }
 0x46c   :  { %v500_v37 = vadd.f32 1.0, %v2339_v34 }
 0x46e   :  { %2340 = vrcp.f32 %v500_v37 }
 0x47b   :  { %v2341_v38 = vpop.eup %2340 }
 0x4dd   :  { %v520_v39 = vpop.permute.xlu1 %519 }
 0x4de   :  { %v2910_v40 = vmul.f32 %v2341_v38, %v520_v39 }
 0x4e0   :  { %2128 = vmatmul.mubr.msk.f32.vlgmr.msra.gmra.mxu1 %vm310_vm3, %v2910_v40 }
 0x4e1   :  { %834 = vmatprep.mubr.f32.mxu1 %v2734_v0 }
 0x5a0   :  { %v594_v41 = vpop.f32.mrf.mxu1 }
 0x5a1   :  { %v599_v42 = vadd.f32 %v594_v41, %v523_v55  ;;  %v650_v55 = vld [vmem:[#allocation13 + $0x78] sm:$0xff] }
 0x5a2   :  { %v596_v43 = vpop.f32.mrf.mxu1  ;;  %685 = vmatprep.subr.mxu0 %v650_v55 }
 0x5a3   :  { %v2925_v44 = vadd.f32 %v596_v43, %v524_v59  ;;  %v2129_v46 = vmul.f32 -1.442695, %v599_v42  ;;  %686 = vmatpush1.msra.mxu0 %v649_v56  ;;  %v767_v59 = vld [vmem:[#allocation14 + $0x78] sm:$0xff] }
 0x5a4   :  { %687 = vmatprep.subr.mxu0 %v648_v52  ;;  %786 = vmatprep.subr.mxu1 %v767_v59 }
 0x5a5   :  { %2342 = vtanh.f32 %v2925_v44  ;;  %688 = vmatpush1.msra.mxu0 %v647_v54  ;;  %787 = vmatpush1.msra.mxu1 %v2930_v61  ;;  %v2130_v27 = vmul.f32 -1.442695, %v2925_v44 }
 0x5a6   :  { %2344 = vpow2.f32 %v2129_v46  ;;  %689 = vmatprep.subr.mxu0 %v646_v57  ;;  %788 = vmatprep.subr.mxu1 %v2932_v62 }
 0x5a7   :  { %690 = vmatpush1.msra.mxu0 %v645_v58  ;;  %789 = vmatpush1.msra.mxu1 %v2935_v1 }
 0x5a8   :  { %691 = vmatprep.subr.mxu0 %v644_v60  ;;  %790 = vmatprep.subr.mxu1 %v2940_v11 }
 0x5a9   :  { %692 = vmatpush1.msra.mxu0 %v643_v63  ;;  %791 = vmatpush1.msra.mxu1 %v2943_v13 }
 0x5aa   :  { %693 = vmatprep.subr.mxu0 %v642_v2  ;;  %792 = vmatprep.subr.mxu1 %v761_v16 }
 0x5ab   :  { %694 = vmatpush1.msra.mxu0 %v641_v3  ;;  %793 = vmatpush1.msra.mxu1 %v760_v17 }
 0x5ac   :  { %695 = vmatprep.subr.mxu0 %v640_v4  ;;  %794 = vmatprep.subr.mxu1 %v759_v18 }
 0x5ad   :  { %696 = vmatpush1.msra.mxu0 %v639_v5  ;;  %795 = vmatpush1.msra.mxu1 %v758_v19 }
 0x5ae   :  { %697 = vmatprep.subr.mxu0 %v638_v6  ;;  %796 = vmatprep.subr.mxu1 %v757_v20 }
 0x5af   :  { %698 = vmatpush1.msra.mxu0 %v637_v10  ;;  %797 = vmatpush1.msra.mxu1 %v756_v21 }
 0x5b0   :  { %699 = vmatprep.subr.mxu0 %v636_v12  ;;  %798 = vmatprep.subr.mxu1 %v755_v22 }
 0x5b1   :  { %700 = vmatpush1.msra.mxu0 %v635_v15  ;;  %799 = vmatpush1.msra.mxu1 %v754_v23 }
 0x5b2   :  { %v2343_v45 = vpop.eup %2342  ;;  %892 = vmatprep.subr.mxu0 %v767_v59  ;;  %800 = vmatprep.subr.mxu1 %v753_v24 }
 0x5b3   :  { %616 = vrot.lane.b32.xlu0 %v2343_v45, %s2735_s4  ;;  %v2345_v49 = vpop.eup %2344  ;;  %801 = vmatpush1.msra.mxu1 %v752_v25 }
 0x5b4   :  { %v607_v50 = vadd.f32 1.0, %v2345_v49  ;;  %835 = vmatmul.mubr.f32.vlgmr.msra.gmra.mxu1 %v2734_v0  ;;  %1000 = vmatprep.subr.mxu1 %v767_v59 }
 0x5b5   :  { %1001 = vmatpush1.msra.mxu1 %v2930_v61  ;;  %1048 = vmatprep.mubr.f32.mxu1 %v2734_v0 }
 0x5b6   :  { %2346 = vrcp.f32 %v607_v50  ;;  %1002 = vmatprep.subr.mxu1 %v2932_v62 }
 0x5b7   :  { %1003 = vmatpush1.msra.mxu1 %v2935_v1 }
 0x5b8   :  { %1004 = vmatprep.subr.mxu1 %v2940_v11 }
 0x5b9   :  { %1005 = vmatpush1.msra.mxu1 %v2943_v13 }
 0x5ba   :  { %1006 = vmatprep.subr.mxu1 %v761_v16 }
 0x5bb   :  { %1007 = vmatpush1.msra.mxu1 %v760_v17 }
 0x5bc   :  { %1008 = vmatprep.subr.mxu1 %v759_v18 }
 0x5bd   :  { %1009 = vmatpush1.msra.mxu1 %v758_v19 }
 0x5be   :  { %1010 = vmatprep.subr.mxu1 %v757_v20 }
 0x5bf   :  { %1011 = vmatpush1.msra.mxu1 %v756_v21 }
 0x5c0   :  { %1012 = vmatprep.subr.mxu1 %v755_v22 }
 0x5c1   :  { %1013 = vmatpush1.msra.mxu1 %v754_v23 }
 0x5c2   :  { %1014 = vmatprep.subr.mxu1 %v753_v24 }
 0x5c3   :  { %v2347_v35 = vpop.eup %2346  ;;  %1015 = vmatpush1.msra.mxu1 %v752_v25 }
 0x5c4   :  { %v614_v7 = vmul.f32 %v2347_v35, %v2906_v28 }
 0x625   :  { %v617_v48 = vpop.permute.xlu0 %616 }
 0x626   :  { %v619_v53 = vmul.f32 %v2347_v35, %v617_v48 }
 0x628   :  { %621 = vrot.lane.b32.xlu1 %v619_v53, %s2735_s4 }
 0x674   :  { %v836_v48 = vpop.f32.mrf.mxu1 }
 0x676   :  { %v838_v58 = vpop.f32.mrf.mxu1 }
 0x69a   :  { %v622_v8 = vpop.permute.xlu1 %621 }
 0x69b   :  { %v624_v9 = vadd.f32 %v622_v8, %v614_v7 }
 0x69d   :  { %2348 = vtanh.f32 %v624_v9 }
 0x69e   :  { %2350 = vpow2.f32 %v2130_v27 }
 0x6aa   :  { %v2349_v26 = vpop.eup %2348 }
 0x6ab   :  { %627 = vrot.lane.b32.xlu0 %v2349_v26, %s2735_s4  ;;  %v2351_v28 = vpop.eup %2350 }
 0x6ac   :  { %v608_v31 = vadd.f32 1.0, %v2351_v28 }
 0x6ae   :  { %2352 = vrcp.f32 %v608_v31 }
 0x6bb   :  { %v2353_v32 = vpop.eup %2352 }
 0x71d   :  { %v628_v34 = vpop.permute.xlu0 %627 }
 0x71e   :  { %v630_v37 = vmul.f32 %v2353_v32, %v628_v34 }
 0x720   :  { %v633_v38 = vsel %vm171_vm4, %v2899_v14, %v630_v37  ;;  %v634_v39 = vsel %vm171_vm4, %v630_v37, %v2899_v14 }
 0x721   :  { %2131 = vmatmul.mubr.msk.f32.vlgmr.msra.gmra.mxu0 %vm310_vm3, %v633_v38 }
 0x722   :  { %739 = vmatprep.mubr.f32.mxu0 %v2734_v0  ;;  %893 = vmatpush1.msra.mxu0 %v2930_v61 }
 0x723   :  { %894 = vmatprep.subr.mxu0 %v2932_v62 }
 0x724   :  { %895 = vmatpush1.msra.mxu0 %v2935_v1 }
 0x725   :  { %2132 = vmatmul.mubr.msk.f32.gmra.mxu0 %vm310_vm3, %v2910_v40  ;;  %896 = vmatprep.subr.mxu0 %v2940_v11  ;;  %v651_v40 = vld [vmem:[%s3084_s7] sm:$0x3]  ;;  %s2736_s7 = smov 32  }
 0x726   :  { %745 = vmatprep.mubr.f32.mxu0 %v2734_v0  ;;  %897 = vmatpush1.msra.mxu0 %v2943_v13  ;;  %v656_v14 = vrot.slane %v651_v40, %v2850_v30  ;;  %v660_v44 = vrot.slane %v651_v40, %v2861_v36 }
 0x727   :  { %898 = vmatprep.subr.mxu0 %v761_v16 }
 0x728   :  { %899 = vmatpush1.msra.mxu0 %v760_v17 }
 0x729   :  { %2133 = vmatmul.mubr.msk.f32.gmra.mxu0 %vm310_vm3, %v634_v39  ;;  %900 = vmatprep.subr.mxu0 %v759_v18 }
 0x72a   :  { %901 = vmatpush1.msra.mxu0 %v758_v19  ;;  %940 = vmatprep.mubr.f32.mxu0 %v2734_v0 }
 0x72b   :  { %902 = vmatprep.subr.mxu0 %v757_v20 }
 0x72c   :  { %903 = vmatpush1.msra.mxu0 %v756_v21 }
 0x72d   :  { %904 = vmatprep.subr.mxu0 %v755_v22 }
 0x72e   :  { %905 = vmatpush1.msra.mxu0 %v754_v23 }
 0x72f   :  { %906 = vmatprep.subr.mxu0 %v753_v24 }
 0x730   :  { %907 = vmatpush1.msra.mxu0 %v752_v25 }
 0x7e1   :  { %v735_v41 = vpop.f32.mrf.mxu0 }
 0x7e2   :  { %v2979_v50 = vadd.f32 %v735_v41, %v656_v14 }
 0x7e3   :  { %v737_v42 = vpop.f32.mrf.mxu0 }
 0x7e4   :  { %v2983_v55 = vadd.f32 %v737_v42, %v660_v44 }
 0x7e5   :  { %v741_v43 = vpop.f32.mrf.mxu0 }
 0x7e6   :  { %v742_v45 = vadd.f32 %v741_v43, %v656_v14 }
 0x7e7   :  { %v743_v46 = vpop.f32.mrf.mxu0 }
 0x7e8   :  { %v744_v0 = vadd.f32 %v743_v46, %v660_v44 }
 0x7e9   :  { %v747_v49 = vpop.f32.mrf.mxu0 }
 0x7ea   :  { %v2981_v35 = vadd.f32 %v747_v49, %v656_v14 }
 0x7eb   :  { %v749_v53 = vpop.f32.mrf.mxu0 }
 0x7ec   :  { %v768_v56 = vsel %vm2866_vm1, %v2979_v50, %v2981_v35  ;;  %v2989_v52 = vadd.f32 %v749_v53, %v660_v44  ;;  %v979_v54 = vsel %vm2866_vm1, %v2981_v35, %v2979_v50 }
 0x7ed   :  { %v841_v62 = vadd.f32 %v836_v48, %v768_v56 }
 0x7ee   :  { %v769_v57 = vsel %vm2872_vm2, %v2983_v55, %v2989_v52  ;;  %v980_v59 = vsel %vm2872_vm2, %v2989_v52, %v2983_v55 }
 0x7ef   :  { %v842_v60 = vadd.f32 %v838_v58, %v769_v57  ;;  %v2134_v63 = vmul.f32 -1.442695, %v841_v62 }
 0x7f1   :  { %2354 = vtanh.f32 %v842_v60  ;;  %v2135_v10 = vmul.f32 -1.442695, %v842_v60 }
 0x7f2   :  { %2356 = vpow2.f32 %v2134_v63 }
 0x7fe   :  { %v2355_v61 = vpop.eup %2354 }
 0x7ff   :  { %858 = vrot.lane.b32.xlu1 %v2355_v61, %s2735_s4  ;;  %v2357_v1 = vpop.eup %2356 }
 0x800   :  { %v849_v2 = vadd.f32 1.0, %v2357_v1 }
 0x802   :  { %2358 = vrcp.f32 %v849_v2 }
 0x80f   :  { %v2359_v3 = vpop.eup %2358 }
 0x810   :  { %v856_v6 = vmul.f32 0.0, %v2359_v3 }
 0x871   :  { %v859_v4 = vpop.permute.xlu1 %858 }
 0x872   :  { %v861_v5 = vmul.f32 %v2359_v3, %v859_v4 }
 0x874   :  { %863 = vrot.lane.b32.xlu0 %v861_v5, %s2735_s4 }
 0x8e6   :  { %v864_v7 = vpop.permute.xlu0 %863 }
 0x8e7   :  { %v866_v8 = vadd.f32 %v864_v7, %v856_v6 }
 0x8e9   :  { %2360 = vtanh.f32 %v866_v8 }
 0x8ea   :  { %2362 = vpow2.f32 %v2135_v10 }
 0x8f6   :  { %v2361_v9 = vpop.eup %2360 }
 0x8f7   :  { %869 = vrot.lane.b32.xlu1 %v2361_v9, %s2735_s4  ;;  %v2363_v11 = vpop.eup %2362 }
 0x8f8   :  { %v850_v12 = vadd.f32 1.0, %v2363_v11 }
 0x8fa   :  { %2364 = vrcp.f32 %v850_v12 }
 0x907   :  { %v2365_v13 = vpop.eup %2364 }
 0x969   :  { %v870_v15 = vpop.permute.xlu1 %869 }
 0x96a   :  { %v3006_v16 = vmul.f32 %v2365_v13, %v870_v15 }
 0x96c   :  { %2136 = vmatmul.mubr.msk.f32.vlgmr.msra.gmra.mxu0 %vm310_vm3, %v3006_v16 }
 0xa2c   :  { %v942_v17 = vpop.f32.mrf.mxu0 }
 0xa2d   :  { %v947_v18 = vadd.f32 %v942_v17, %v742_v45 }
 0xa2e   :  { %v944_v19 = vpop.f32.mrf.mxu0 }
 0xa2f   :  { %v948_v20 = vadd.f32 %v944_v19, %v744_v0  ;;  %v2137_v22 = vmul.f32 -1.442695, %v947_v18 }
 0xa31   :  { %2366 = vtanh.f32 %v948_v20  ;;  %v2138_v37 = vmul.f32 -1.442695, %v948_v20 }
 0xa32   :  { %2368 = vpow2.f32 %v2137_v22 }
 0xa3e   :  { %v2367_v21 = vpop.eup %2366 }
 0xa3f   :  { %964 = vrot.lane.b32.xlu0 %v2367_v21, %s2735_s4  ;;  %v2369_v23 = vpop.eup %2368 }
 0xa40   :  { %v955_v24 = vadd.f32 1.0, %v2369_v23 }
 0xa42   :  { %2370 = vrcp.f32 %v955_v24 }
 0xa4f   :  { %v2371_v25 = vpop.eup %2370 }
 0xa50   :  { %v962_v28 = vmul.f32 %v2371_v25, %v866_v8 }
 0xab1   :  { %v965_v26 = vpop.permute.xlu0 %964 }
 0xab2   :  { %v967_v27 = vmul.f32 %v2371_v25, %v965_v26 }
 0xab4   :  { %969 = vrot.lane.b32.xlu1 %v967_v27, %s2735_s4 }
 0xb26   :  { %v970_v31 = vpop.permute.xlu1 %969 }
 0xb27   :  { %v972_v32 = vadd.f32 %v970_v31, %v962_v28 }
 0xb29   :  { %2372 = vtanh.f32 %v972_v32 }
 0xb2a   :  { %2374 = vpow2.f32 %v2138_v37 }
 0xb36   :  { %v2373_v34 = vpop.eup %2372 }
 0xb37   :  { %975 = vrot.lane.b32.xlu0 %v2373_v34, %s2735_s4  ;;  %v2375_v38 = vpop.eup %2374 }
 0xb38   :  { %v956_v39 = vadd.f32 1.0, %v2375_v38 }
 0xb3a   :  { %2376 = vrcp.f32 %v956_v39 }
 0xb47   :  { %v2377_v40 = vpop.eup %2376 }
 0xba9   :  { %v976_v41 = vpop.permute.xlu0 %975 }
 0xbaa   :  { %v978_v42 = vmul.f32 %v2377_v40, %v976_v41 }
 0xbac   :  { %2139 = vmatmul.mubr.msk.f32.vlgmr.msra.gmra.mxu1 %vm310_vm3, %v978_v42 }
 0xc6c   :  { %v1050_v14 = vpop.f32.mrf.mxu1 }
 0xc6d   :  { %v1055_v43 = vadd.f32 %v1050_v14, %v979_v54 }
 0xc6e   :  { %v1052_v44 = vpop.f32.mrf.mxu1 }
 0xc6f   :  { %v1056_v45 = vadd.f32 %v1052_v44, %v980_v59  ;;  %v2140_v0 = vmul.f32 -1.442695, %v1055_v43 }
 0xc71   :  { %2378 = vtanh.f32 %v1056_v45  ;;  %v2141_v52 = vmul.f32 -1.442695, %v1056_v45 }
 0xc72   :  { %2380 = vpow2.f32 %v2140_v0 }
 0xc7e   :  { %v2379_v46 = vpop.eup %2378 }
 0xc7f   :  { %1072 = vrot.lane.b32.xlu1 %v2379_v46, %s2735_s4  ;;  %v2381_v49 = vpop.eup %2380 }
 0xc80   :  { %v1063_v48 = vadd.f32 1.0, %v2381_v49 }
 0xc82   :  { %2382 = vrcp.f32 %v1063_v48 }
 0xc8f   :  { %v2383_v47 = vpop.eup %2382 }
 0xc90   :  { %v1070_v35 = vmul.f32 %v2383_v47, %v972_v32 }
 0xcf1   :  { %v1073_v53 = vpop.permute.xlu1 %1072 }
 0xcf2   :  { %v1075_v50 = vmul.f32 %v2383_v47, %v1073_v53 }
 0xcf4   :  { %1077 = vrot.lane.b32.xlu0 %v1075_v50, %s2735_s4 }
 0xd66   :  { %v1078_v51 = vpop.permute.xlu0 %1077 }
 0xd67   :  { %v1080_v56 = vadd.f32 %v1078_v51, %v1070_v35 }
 0xd69   :  { %2384 = vtanh.f32 %v1080_v56 }
 0xd6a   :  { %2386 = vpow2.f32 %v2141_v52 }
 0xd76   :  { %v2385_v55 = vpop.eup %2384 }
 0xd77   :  { %1083 = vrot.lane.b32.xlu1 %v2385_v55, %s2735_s4  ;;  %v2387_v54 = vpop.eup %2386 }
 0xd78   :  { %v1064_v57 = vadd.f32 1.0, %v2387_v54 }
 0xd7a   :  { %2388 = vrcp.f32 %v1064_v57 }
 0xd7b   :  { %1094 = vrot.lane.b32.xlu1 %v978_v42, %s2736_s7 }
 0xd7c   :  { %2669 = shalt.err (!%p2666_p6)  }
 0xd7d   :  { %129 = dma.hbm_to_vmem [thread:$0]  %s3085_s8, 9216, %s127_s18, [#allocation4] }
 0xd7e   :  { %s2678_s23 = scalar_lea.vmem %s139_s19, 4096  ;;  %p2683_p8 = scmp.lt.s32.totalorder %s139_s19, %s139_s19 }
 0xd7f   :  { %p2679_p7 = scmp.ne.s32.totalorder %s139_s19, %s2678_s23  ;;  %p2684_p9 = scmp.lt.s32.totalorder %s2678_s23, %s2678_s23 }
 0xd81   :  { %p2685_p10 = por %p2684_p9, %p2683_p8 }
 0xd83   :  { %p2686_p11 = pnand %p2685_p10, %p2679_p7 }
 0xd85   :  { %2689 = shalt.err (!%p2686_p11)  }
 0xd86   :  { %141 = dma.hbm_to_vmem [thread:$0]  %s3087_s10, 4096, %s139_s19, [#allocation4 + $0x1]  ;;  %v1089_v1 = vld [vmem:[#allocation5] sm:$0xff]  ;;  %vm1101_vm5 = vcmask 785408  }
 0xd87   :  { %v2389_v58 = vpop.eup %2388  ;;  %s2739_s8 = smov 96  }
 0xde9   :  { %v1084_v59 = vpop.permute.xlu1 %1083 }
 0xdea   :  { %v1086_v60 = vmul.f32 %v2389_v58, %v1084_v59 }
 0xdec   :  { %v1087_v61 = vsel %vm171_vm4, %v3006_v16, %v1086_v60  ;;  %v1088_v62 = vsel %vm171_vm4, %v1086_v60, %v3006_v16 }
 0xded   :  { %v2313_v63 = vpack.i.bf16 %v1088_v62, %v1087_v61  ;;  %v1095_v5 = vpop.permute.xlu1 %1094 }
 0xdef   :  { %2314 = vrot.lane.b32.xlu0 %v2313_v63, %s2739_s8 }
 0xe61   :  { %v2315_v2 = vpop.permute.xlu0 %2314 }
 0xe62   :  { %v2317_v3 = vunpack.i.h.bf16 %v2315_v2  ;;  %v2316_v4 = vunpack.i.l.bf16 %v2315_v2 }
 0xe64   :  { %v3039_v6 = vsel %vm1101_vm5, %v1089_v1, %v2316_v4  ;;  %v1103_v7 = vsel %vm195_vm0, %v2316_v4, %v1095_v5 }
 0xe65   :  { %v1104_v8 = vsel %vm1101_vm5, %v1103_v7, %v2317_v3 }
 0xe66   :  { %2718 = dma.done.wait [#allocation4], 9216 }
 0xe67   :  { %2719 = vsyncadd [#allocation4], 4294958080  ;;  %v1110_v9 = vpack.c.bf16 %v1104_v8, %v1104_v8  ;;  %v2740_v10 = vmov 0   ;;  %v2390_v33 = vld [vmem:[#allocation2 + $0xe4] ss:$16 sps:$4 sm:$0xff]   ;;  %v3043_v20 = vpack.c.bf16 %v2317_v3, %v2317_v3 }
 0xe68   :  { %1642 = vmatprep.mubr.bf16.mxu1 %v2740_v10  ;;  %v2392_v11 = vld [vmem:[#allocation2 + $0x224] ss:$16 sps:$4 sm:$0xff]   ;;  %1569 = vmatprep.subr.bf16.mxu0 %v2390_v33  ;;  %v2394_v12 = vld [vmem:[#allocation2 + $0xe0] ss:$16 sps:$4 sm:$0xff]   ;;  %v2404_v21 = vld [vmem:[#allocation2 + $0xe8] ss:$16 sps:$4 sm:$0xff]  }
 0xe69   :  { %1601 = vmatprep.mubr.bf16.mxu0 %v1110_v9  ;;  %v2395_v13 = vld [vmem:[#allocation2 + $0x220] ss:$16 sps:$4 sm:$0xff]   ;;  %1622 = vmatprep.subr.bf16.mxu1 %v2392_v11  ;;  %v2396_v15 = vld [vmem:[#allocation2 + $0xc4] ss:$16 sps:$4 sm:$0xff]   ;;  %v2406_v22 = vld [vmem:[#allocation2 + $0xec] ss:$16 sps:$4 sm:$0xff]  }
 0xe6a   :  { %1570 = vmatpush1.bf16.msra.mxu0 %v2394_v12  ;;  %1623 = vmatpush1.bf16.msra.mxu1 %v2395_v13  ;;  %v2398_v16 = vld [vmem:[#allocation2 + $0x204] ss:$16 sps:$4 sm:$0xff]   ;;  %v2400_v17 = vld [vmem:[#allocation2 + $0xc0] ss:$16 sps:$4 sm:$0xff]   ;;  %v2412_v25 = vld [vmem:[#allocation2 + $0xcc] ss:$16 sps:$4 sm:$0xff]  }
 0xe6b   :  { %1571 = vmatprep.subr.bf16.mxu0 %v2396_v15  ;;  %v2401_v18 = vld [vmem:[#allocation2 + $0x200] ss:$16 sps:$4 sm:$0xff]   ;;  %1624 = vmatprep.subr.bf16.mxu1 %v2398_v16  ;;  %v2402_v19 = vld [vmem:[#allocation2 + $0xa4] ss:$16 sps:$4 sm:$0xff]   ;;  %v2410_v26 = vld [vmem:[#allocation2 + $0xc8] ss:$16 sps:$4 sm:$0xff]  }
 0xe6c   :  { %v2407_v23 = vld [vmem:[#allocation2 + $0xa0] ss:$16 sps:$4 sm:$0xff]   ;;  %v2408_v24 = vld [vmem:[#allocation2 + $0x84] ss:$16 sps:$4 sm:$0xff]   ;;  %v2418_v31 = vld [vmem:[#allocation2 + $0xac] ss:$16 sps:$4 sm:$0xff]  }
 0xe6d   :  { %v2413_v27 = vld [vmem:[#allocation2 + $0x80] ss:$16 sps:$4 sm:$0xff]   ;;  %v2414_v28 = vld [vmem:[#allocation2 + $0x64] ss:$16 sps:$4 sm:$0xff]   ;;  %v2416_v32 = vld [vmem:[#allocation2 + $0xa8] ss:$16 sps:$4 sm:$0xff]  }
 0xe6e   :  { %1572 = vmatpush1.bf16.msra.mxu0 %v2400_v17  ;;  %1625 = vmatpush1.bf16.msra.mxu1 %v2401_v18  ;;  %v2419_v34 = vld [vmem:[#allocation2 + $0x60] ss:$16 sps:$4 sm:$0xff]   ;;  %v2420_v37 = vld [vmem:[#allocation2 + $0x44] ss:$16 sps:$4 sm:$0xff]   ;;  %v2424_v38 = vld [vmem:[#allocation2 + $0x8c] ss:$16 sps:$4 sm:$0xff]  }
 0xe6f   :  { %1573 = vmatprep.subr.bf16.mxu0 %v2402_v19  ;;  %1651 = vmatprep.subr.bf16.mxu1 %v2406_v22  ;;  %v2422_v39 = vld [vmem:[#allocation2 + $0x88] ss:$16 sps:$4 sm:$0xff]   ;;  %v2425_v40 = vld [vmem:[#allocation2 + $0x40] ss:$16 sps:$4 sm:$0xff]   ;;  %v2426_v41 = vld [vmem:[#allocation2 + $0x24] ss:$16 sps:$4 sm:$0xff]   ;;  %v1109_v19 = vpack.c.bf16 %v3039_v6, %v3039_v6 }
 0xe70   :  { %v2430_v42 = vld [vmem:[#allocation2 + $0x6c] ss:$16 sps:$4 sm:$0xff]   ;;  %v2428_v14 = vld [vmem:[#allocation2 + $0x68] ss:$16 sps:$4 sm:$0xff]   ;;  %v2431_v43 = vld [vmem:[#allocation2 + $0x20] ss:$16 sps:$4 sm:$0xff]  }
 0xe71   :  { %2214 = vmatmul.mubr.msk.bf16.vlgmr.msra.gmra.mxu1 %vm195_vm0, %v3043_v20  ;;  %v2432_v44 = vld [vmem:[#allocation2 + $0x4] ss:$16 sps:$4 sm:$0xff]   ;;  %v2436_v45 = vld [vmem:[#allocation2 + $0x4c] ss:$16 sps:$4 sm:$0xff]   ;;  %v2434_v46 = vld [vmem:[#allocation2 + $0x48] ss:$16 sps:$4 sm:$0xff]  }
 0xe72   :  { %1574 = vmatpush1.bf16.msra.mxu0 %v2407_v23  ;;  %1652 = vmatpush1.bf16.msra.mxu1 %v2404_v21  ;;  %v2437_v0 = vld [vmem:[#allocation2] ss:$16 sps:$4 sm:$0xff]   ;;  %v2438_v49 = vld [vmem:[#allocation2 + $0x1e4] ss:$16 sps:$4 sm:$0xff]   ;;  %v2442_v48 = vld [vmem:[#allocation2 + $0x2c] ss:$16 sps:$4 sm:$0xff]  }
 0xe73   :  { %1575 = vmatprep.subr.bf16.mxu0 %v2408_v24  ;;  %1653 = vmatprep.subr.bf16.mxu1 %v2412_v25  ;;  %v2440_v47 = vld [vmem:[#allocation2 + $0x28] ss:$16 sps:$4 sm:$0xff]   ;;  %v2443_v53 = vld [vmem:[#allocation2 + $0x1e0] ss:$16 sps:$4 sm:$0xff]   ;;  %v2444_v50 = vld [vmem:[#allocation2 + $0x1c4] ss:$16 sps:$4 sm:$0xff]  }
 0xe74   :  { %1683 = vmatprep.mubr.bf16.mxu1 %v1110_v9  ;;  %v2448_v35 = vld [vmem:[#allocation2 + $0xc] ss:$16 sps:$4 sm:$0xff]   ;;  %v2446_v51 = vld [vmem:[#allocation2 + $0x8] ss:$16 sps:$4 sm:$0xff]   ;;  %v2449_v56 = vld [vmem:[#allocation2 + $0x1c0] ss:$16 sps:$4 sm:$0xff]  }
 0xe75   :  { %v2450_v55 = vld [vmem:[#allocation2 + $0x1a4] ss:$16 sps:$4 sm:$0xff]   ;;  %v2454_v52 = vld [vmem:[#allocation2 + $0x1ec] ss:$16 sps:$4 sm:$0xff]   ;;  %v2452_v54 = vld [vmem:[#allocation2 + $0x1e8] ss:$16 sps:$4 sm:$0xff]  }
 0xe76   :  { %1576 = vmatpush1.bf16.msra.mxu0 %v2413_v27  ;;  %1654 = vmatpush1.bf16.msra.mxu1 %v2410_v26  ;;  %v2455_v57 = vld [vmem:[#allocation2 + $0x1a0] ss:$16 sps:$4 sm:$0xff]   ;;  %v2456_v58 = vld [vmem:[#allocation2 + $0x184] ss:$16 sps:$4 sm:$0xff]   ;;  %v2460_v59 = vld [vmem:[#allocation2 + $0x1cc] ss:$16 sps:$4 sm:$0xff]  }
 0xe77   :  { %1577 = vmatprep.subr.bf16.mxu0 %v2414_v28  ;;  %1655 = vmatprep.subr.bf16.mxu1 %v2418_v31  ;;  %v2458_v60 = vld [vmem:[#allocation2 + $0x1c8] ss:$16 sps:$4 sm:$0xff]   ;;  %v2461_v61 = vld [vmem:[#allocation2 + $0x180] ss:$16 sps:$4 sm:$0xff]   ;;  %v2462_v62 = vld [vmem:[#allocation2 + $0x164] ss:$16 sps:$4 sm:$0xff]  }
 0xe78   :  { %v2466_v63 = vld [vmem:[#allocation2 + $0x1ac] ss:$16 sps:$4 sm:$0xff]   ;;  %v2464_v1 = vld [vmem:[#allocation2 + $0x1a8] ss:$16 sps:$4 sm:$0xff]   ;;  %v2467_v2 = vld [vmem:[#allocation2 + $0x160] ss:$16 sps:$4 sm:$0xff]  }
 0xe79   :  { %v2468_v3 = vld [vmem:[#allocation2 + $0x144] ss:$16 sps:$4 sm:$0xff]   ;;  %v2472_v4 = vld [vmem:[#allocation2 + $0x18c] ss:$16 sps:$4 sm:$0xff]   ;;  %v2470_v5 = vld [vmem:[#allocation2 + $0x188] ss:$16 sps:$4 sm:$0xff]  }
 0xe7a   :  { %1578 = vmatpush1.bf16.msra.mxu0 %v2419_v34  ;;  %1656 = vmatpush1.bf16.msra.mxu1 %v2416_v32  ;;  %v2473_v7 = vld [vmem:[#allocation2 + $0x140] ss:$16 sps:$4 sm:$0xff]   ;;  %v2474_v8 = vld [vmem:[#allocation2 + $0x124] ss:$16 sps:$4 sm:$0xff]   ;;  %v2478_v9 = vld [vmem:[#allocation2 + $0x16c] ss:$16 sps:$4 sm:$0xff]  }
 0xe7b   :  { %1579 = vmatprep.subr.bf16.mxu0 %v2420_v37  ;;  %1657 = vmatprep.subr.bf16.mxu1 %v2424_v38  ;;  %v2476_v33 = vld [vmem:[#allocation2 + $0x168] ss:$16 sps:$4 sm:$0xff]   ;;  %v2479_v11 = vld [vmem:[#allocation2 + $0x120] ss:$16 sps:$4 sm:$0xff]   ;;  %v2480_v12 = vld [vmem:[#allocation2 + $0x104] ss:$16 sps:$4 sm:$0xff]  }
 0xe7c   :  { %v2484_v13 = vld [vmem:[#allocation2 + $0x14c] ss:$16 sps:$4 sm:$0xff]   ;;  %v2482_v15 = vld [vmem:[#allocation2 + $0x148] ss:$16 sps:$4 sm:$0xff]   ;;  %v2485_v16 = vld [vmem:[#allocation2 + $0x100] ss:$16 sps:$4 sm:$0xff]  }
 0xe7d   :  { %v2488_v17 = vld [vmem:[#allocation2 + $0x12c] ss:$16 sps:$4 sm:$0xff]   ;;  %v2486_v21 = vld [vmem:[#allocation2 + $0x128] ss:$16 sps:$4 sm:$0xff]   ;;  %v1184_v32 = vld [vmem:[%s3086_s9] sm:$0xf] }
 0xe7e   :  { %1580 = vmatpush1.bf16.msra.mxu0 %v2425_v40  ;;  %1658 = vmatpush1.bf16.msra.mxu1 %v2422_v39  ;;  %v2491_v18 = vld [vmem:[#allocation2 + $0x22c] ss:$16 sps:$4 sm:$0xff]   ;;  %v2489_v22 = vld [vmem:[#allocation2 + $0x228] ss:$16 sps:$4 sm:$0xff]   ;;  %v1189_v34 = vrot.slane %v1184_v32, %v2850_v30  ;;  %v1193_v37 = vrot.slane %v1184_v32, %v2861_v36  ;;  %v1196_v39 = vsub.s32 2, %v2847_v29 }
 0xe7f   :  { %1581 = vmatprep.subr.bf16.mxu0 %v2426_v41  ;;  %1659 = vmatprep.subr.bf16.mxu1 %v2430_v42  ;;  %v2494_v23 = vld [vmem:[#allocation2 + $0x10c] ss:$16 sps:$4 sm:$0xff]   ;;  %v2492_v25 = vld [vmem:[#allocation2 + $0x108] ss:$16 sps:$4 sm:$0xff]   ;;  %v1200_v42 = vsub.s32 3, %v2847_v29 }
 0xe80   :  { %v2497_v24 = vld [vmem:[#allocation2 + $0x20c] ss:$16 sps:$4 sm:$0xff]   ;;  %v2495_v26 = vld [vmem:[#allocation2 + $0x208] ss:$16 sps:$4 sm:$0xff]  }
 0xe81   :  { %v1201_v30 = vrot.slane %v1184_v32, %v1200_v42 }
 0xe82   :  { %1582 = vmatpush1.bf16.msra.mxu0 %v2431_v43  ;;  %1660 = vmatpush1.bf16.msra.mxu1 %v2428_v14 }
 0xe83   :  { %1583 = vmatprep.subr.bf16.mxu0 %v2432_v44  ;;  %1661 = vmatprep.subr.bf16.mxu1 %v2436_v45  ;;  %v1197_v45 = vrot.slane %v1184_v32, %v1196_v39 }
 0xe86   :  { %1584 = vmatpush1.bf16.msra.mxu0 %v2437_v0  ;;  %1662 = vmatpush1.bf16.msra.mxu1 %v2434_v46 }
 0xe87   :  { %1585 = vmatprep.subr.bf16.mxu0 %v2438_v49  ;;  %1663 = vmatprep.subr.bf16.mxu1 %v2442_v48 }
 0xe8a   :  { %1586 = vmatpush2.bf16.msra.mxu0 %v2443_v53  ;;  %1664 = vmatpush1.bf16.msra.mxu1 %v2440_v47 }
 0xe8b   :  { %1587 = vmatprep.subr.bf16.mxu0 %v2444_v50  ;;  %1665 = vmatprep.subr.bf16.mxu1 %v2448_v35 }
 0xe8e   :  { %1588 = vmatpush2.bf16.msra.mxu0 %v2449_v56  ;;  %1666 = vmatpush1.bf16.msra.mxu1 %v2446_v51 }
 0xe8f   :  { %1589 = vmatprep.subr.bf16.mxu0 %v2450_v55  ;;  %1667 = vmatprep.subr.bf16.mxu1 %v2454_v52 }
 0xe92   :  { %1590 = vmatpush2.bf16.msra.mxu0 %v2455_v57  ;;  %1668 = vmatpush2.bf16.msra.mxu1 %v2452_v54 }
 0xe93   :  { %1591 = vmatprep.subr.bf16.mxu0 %v2456_v58  ;;  %1669 = vmatprep.subr.bf16.mxu1 %v2460_v59 }
 0xe96   :  { %1592 = vmatpush2.bf16.msra.mxu0 %v2461_v61  ;;  %1670 = vmatpush2.bf16.msra.mxu1 %v2458_v60 }
 0xe97   :  { %1593 = vmatprep.subr.bf16.mxu0 %v2462_v62  ;;  %1671 = vmatprep.subr.bf16.mxu1 %v2466_v63 }
 0xe9a   :  { %1594 = vmatpush2.bf16.msra.mxu0 %v2467_v2  ;;  %1672 = vmatpush2.bf16.msra.mxu1 %v2464_v1 }
 0xe9b   :  { %1595 = vmatprep.subr.bf16.mxu0 %v2468_v3  ;;  %1673 = vmatprep.subr.bf16.mxu1 %v2472_v4 }
 0xe9e   :  { %1596 = vmatpush2.bf16.msra.mxu0 %v2473_v7  ;;  %1674 = vmatpush2.bf16.msra.mxu1 %v2470_v5 }
 0xe9f   :  { %1597 = vmatprep.subr.bf16.mxu0 %v2474_v8  ;;  %1675 = vmatprep.subr.bf16.mxu1 %v2478_v9 }
 0xea2   :  { %1598 = vmatpush2.bf16.msra.mxu0 %v2479_v11  ;;  %1676 = vmatpush2.bf16.msra.mxu1 %v2476_v33 }
 0xea3   :  { %1599 = vmatprep.subr.bf16.mxu0 %v2480_v12  ;;  %1677 = vmatprep.subr.bf16.mxu1 %v2484_v13 }
 0xea6   :  { %1600 = vmatpush2.bf16.msra.mxu0 %v2485_v16  ;;  %1678 = vmatpush2.bf16.msra.mxu1 %v2482_v15 }
 0xea7   :  { %1679 = vmatprep.subr.bf16.mxu1 %v2488_v17  ;;  %1704 = vmatprep.subr.bf16.mxu0 %v2491_v18 }
 0xea9   :  { %1602 = vmatmul.mubr.bf16.vlgmr.msra.gmra.mxu0 %v1109_v19 }
 0xeaa   :  { %1680 = vmatpush2.bf16.msra.mxu1 %v2486_v21  ;;  %1705 = vmatpush1.bf16.msra.mxu0 %v2489_v22 }
 0xeab   :  { %1681 = vmatprep.subr.bf16.mxu1 %v2494_v23  ;;  %1706 = vmatprep.subr.bf16.mxu0 %v2497_v24 }
 0xeac   :  { %1724 = vmatprep.mubr.bf16.mxu0 %v2740_v10 }
 0xeae   :  { %1682 = vmatpush2.bf16.msra.mxu1 %v2492_v25  ;;  %1707 = vmatpush1.bf16.msra.mxu0 %v2495_v26 }
 0xeb1   :  { %1684 = vmatmul.mubr.bf16.vlgmr.msra.gmra.mxu1 %v1109_v19  ;;  %2215 = vmatmul.mubr.msk.bf16.vlgmr.msra.gmra.mxu0 %vm195_vm0, %v3043_v20 }
 0xf31   :  { %v1644_v6 = vpop.f32.mrf.mxu1 }
 0xf33   :  { %v1646_v27 = vpop.f32.mrf.mxu1 }
 0xf35   :  { %v1648_v28 = vpop.f32.mrf.mxu1 }
 0xf37   :  { %v1649_v31 = vpop.f32.mrf.mxu1 }
 0xf69   :  { %v1603_v38 = vpop.f32.mrf.mxu0 }
 0xf6a   :  { %v1604_v10 = vadd.f32 %v1603_v38, %v1189_v34 }
 0xf6b   :  { %v1605_v40 = vpop.f32.mrf.mxu0 }
 0xf6c   :  { %v3058_v41 = vadd.f32 %v1644_v6, %v1604_v10  ;;  %v1606_v20 = vadd.f32 %v1605_v40, %v1193_v37 }
 0xf6d   :  { %v1607_v14 = vpop.f32.mrf.mxu0 }
 0xf6e   :  { %v1733_v43 = vmax.f32 %v3058_v41, 0.0  ;;  %v1647_v44 = vadd.f32 %v1646_v27, %v1606_v20 }
 0xf6f   :  { %v1608_v46 = vpop.f32.mrf.mxu0 }
 0xf70   :  { %v1734_v0 = vmax.f32 %v1647_v44, 0.0 }
 0xf71   :  { %v1685_v49 = vpop.f32.mrf.mxu1  ;;  %v1726_v36 = vpop.f32.mrf.mxu0 }
 0xf72   :  { %v1686_v48 = vadd.f32 %v1685_v49, %v1197_v45 }
 0xf73   :  { %v1687_v47 = vpop.f32.mrf.mxu1  ;;  %v1728_v53 = vpop.f32.mrf.mxu0 }
 0xf74   :  { %v3062_v50 = vadd.f32 %v1726_v36, %v1686_v48  ;;  %v1688_v35 = vadd.f32 %v1687_v47, %v1201_v30 }
 0xf75   :  { %v1689_v51 = vpop.f32.mrf.mxu1  ;;  %v1730_v56 = vpop.f32.mrf.mxu0 }
 0xf76   :  { %v1735_v29 = vmax.f32 %v3062_v50, 0.0  ;;  %v1729_v55 = vadd.f32 %v1728_v53, %v1688_v35 }
 0xf77   :  { %v1690_v52 = vpop.f32.mrf.mxu1  ;;  %v1731_v54 = vpop.f32.mrf.mxu0 }
 0xf78   :  { %v1736_v57 = vmax.f32 %v1729_v55, 0.0 }
 0xf79   :  { %2720 = dma.done.wait [#allocation4 + $0x1], 4096 }
 0xf7a   :  { %2721 = vsyncadd [#allocation4 + $0x1], 4294963200  ;;  %v1742_v58 = vpack.c.bf16 %v1734_v0, %v1734_v0  ;;  %v1744_v59 = vpack.c.bf16 %v1736_v57, %v1736_v57  ;;  %v2498_v60 = vld [vmem:[#allocation3 + $0x78] sm:$0xff]   ;;  %v2502_v1 = vld [vmem:[#allocation3 + $0x70] sm:$0xff]   ;;  %v1741_v34 = vpack.c.bf16 %v1733_v43, %v1733_v43  ;;  %v1743_v37 = vpack.c.bf16 %v1735_v29, %v1735_v29  ;;  %s2741_s0 = smov [#allocation16]  }
 0xf7b   :  { %v2499_v61 = vld [vmem:[#allocation3 + $0xf8] sm:$0xff]   ;;  %2251 = vmatprep.subr.bf16.mxu0 %v2498_v60  ;;  %v2503_v2 = vld [vmem:[#allocation3 + $0xf0] sm:$0xff]   ;;  %v2506_v5 = vld [vmem:[#allocation3 + $0x68] sm:$0xff]   ;;  %s2095_s27 = sshll.u32 %s2741_s0, 4  ;;  %s2096_s27 = int_to_ptr.vmem [resolvable:$true] %s2095_s27 }
 0xf7c   :  { %2040 = vmatprep.mubr.bf16.mxu0 %v1742_v58  ;;  %2080 = vmatprep.mubr.bf16.mxu1 %v1744_v59  ;;  %v2500_v62 = vld [vmem:[#allocation3 + $0x38] sm:$0xff]   ;;  %v2504_v3 = vld [vmem:[#allocation3 + $0x30] sm:$0xff]   ;;  %v2507_v7 = vld [vmem:[#allocation3 + $0xe8] sm:$0xff]   ;;  %s2690_s28 = scalar_lea.vmem %s2096_s27, 128  ;;  %p2695_p13 = scmp.lt.s32.totalorder %s2096_s27, %s2096_s27 }
 0xf7d   :  { %2273 = vmatprep.subr.bf16.mxu1 %v2499_v61  ;;  %v2501_v63 = vld [vmem:[#allocation3 + $0xb8] sm:$0xff]   ;;  %2252 = vmatpush3.bf16.msra.mxu0 %v2500_v62  ;;  %v2505_v4 = vld [vmem:[#allocation3 + $0xb0] sm:$0xff]   ;;  %v2508_v8 = vld [vmem:[#allocation3 + $0x28] sm:$0xff]   ;;  %p2691_p12 = scmp.ne.s32.totalorder %s2096_s27, %s2690_s28  ;;  %p2696_p0 = scmp.lt.s32.totalorder %s2690_s28, %s2690_s28 }
 0xf7e   :  { %2274 = vmatpush3.bf16.msra.mxu1 %v2501_v63  ;;  %2253 = vmatprep.subr.bf16.mxu0 %v2502_v1  ;;  %v2509_v9 = vld [vmem:[#allocation3 + $0xa8] sm:$0xff]   ;;  %v2510_v33 = vld [vmem:[#allocation3 + $0x60] sm:$0xff]   ;;  %v2514_v15 = vld [vmem:[#allocation3 + $0x58] sm:$0xff]  }
 0xf7f   :  { %2275 = vmatprep.subr.bf16.mxu1 %v2503_v2  ;;  %v2511_v11 = vld [vmem:[#allocation3 + $0xe0] sm:$0xff]   ;;  %v2515_v16 = vld [vmem:[#allocation3 + $0xd8] sm:$0xff]   ;;  %v2518_v19 = vld [vmem:[#allocation3 + $0x50] sm:$0xff]   ;;  %p2697_p1 = por %p2696_p0, %p2695_p13 }
 0xf80   :  { %v2512_v12 = vld [vmem:[#allocation3 + $0x20] sm:$0xff]   ;;  %v2516_v17 = vld [vmem:[#allocation3 + $0x18] sm:$0xff]   ;;  %v2519_v21 = vld [vmem:[#allocation3 + $0xd0] sm:$0xff]  }
 0xf81   :  { %2254 = vmatpush3.bf16.msra.mxu0 %v2504_v3  ;;  %v2513_v13 = vld [vmem:[#allocation3 + $0xa0] sm:$0xff]   ;;  %v2517_v18 = vld [vmem:[#allocation3 + $0x98] sm:$0xff]   ;;  %v2520_v22 = vld [vmem:[#allocation3 + $0x10] sm:$0xff]   ;;  %p2698_p2 = pnand %p2697_p1, %p2691_p12 }
 0xf82   :  { %2276 = vmatpush3.bf16.msra.mxu1 %v2505_v4  ;;  %2255 = vmatprep.subr.bf16.mxu0 %v2506_v5  ;;  %v2521_v23 = vld [vmem:[#allocation3 + $0x90] sm:$0xff]   ;;  %v2522_v24 = vld [vmem:[#allocation3 + $0x48] sm:$0xff]   ;;  %v2526_v27 = vld [vmem:[#allocation3 + $0x40] sm:$0xff]  }
 0xf83   :  { %2277 = vmatprep.subr.bf16.mxu1 %v2507_v7  ;;  %v2523_v25 = vld [vmem:[#allocation3 + $0xc8] sm:$0xff]   ;;  %v2527_v28 = vld [vmem:[#allocation3 + $0xc0] sm:$0xff]  }
 0xf84   :  { %v2524_v26 = vld [vmem:[#allocation3 + $0x8] sm:$0xff]   ;;  %v2528_v31 = vld [vmem:[#allocation3] sm:$0xff]  }
 0xf85   :  { %2256 = vmatpush3.bf16.msra.mxu0 %v2508_v8  ;;  %v2525_v6 = vld [vmem:[#allocation3 + $0x88] sm:$0xff]   ;;  %v2529_v32 = vld [vmem:[#allocation3 + $0x80] sm:$0xff]  }
 0xf86   :  { %2278 = vmatpush3.bf16.msra.mxu1 %v2509_v9  ;;  %2257 = vmatprep.subr.bf16.mxu0 %v2510_v33  ;;  %v2216_v39 = vld [vmem:[%s3088_s11] ss:$0 sm:$0xff] }
 0xf87   :  { %2279 = vmatprep.subr.bf16.mxu1 %v2511_v11 }
 0xf89   :  { %2258 = vmatpush3.bf16.msra.mxu0 %v2512_v12 }
 0xf8a   :  { %2280 = vmatpush3.bf16.msra.mxu1 %v2513_v13  ;;  %2259 = vmatprep.subr.bf16.mxu0 %v2514_v15 }
 0xf8b   :  { %2281 = vmatprep.subr.bf16.mxu1 %v2515_v16 }
 0xf8d   :  { %2260 = vmatpush3.bf16.msra.mxu0 %v2516_v17 }
 0xf8e   :  { %2282 = vmatpush3.bf16.msra.mxu1 %v2517_v18  ;;  %2261 = vmatprep.subr.bf16.mxu0 %v2518_v19 }
 0xf8f   :  { %2283 = vmatprep.subr.bf16.mxu1 %v2519_v21 }
 0xf91   :  { %2262 = vmatpush3.bf16.msra.mxu0 %v2520_v22 }
 0xf92   :  { %2284 = vmatpush3.bf16.msra.mxu1 %v2521_v23  ;;  %2263 = vmatprep.subr.bf16.mxu0 %v2522_v24 }
 0xf93   :  { %2285 = vmatprep.subr.bf16.mxu1 %v2523_v25 }
 0xf95   :  { %2264 = vmatpush3.bf16.msra.mxu0 %v2524_v26 }
 0xf96   :  { %2286 = vmatpush3.bf16.msra.mxu1 %v2525_v6  ;;  %2265 = vmatprep.subr.bf16.mxu0 %v2526_v27 }
 0xf97   :  { %2287 = vmatprep.subr.bf16.mxu1 %v2527_v28 }
 0xf99   :  { %2266 = vmatpush3.bf16.msra.mxu0 %v2528_v31 }
 0xf9a   :  { %2288 = vmatpush3.bf16.msra.mxu1 %v2529_v32 }
 0xf9c   :  { %2041 = vmatmul.mubr.bf16.vlgmr.msra.gmra.mxu0 %v1741_v34 }
 0xf9d   :  { %2081 = vmatmul.mubr.bf16.vlgmr.msra.gmra.mxu1 %v1743_v37 }
0x105c   :  { %v2267_v38 = vpop.f32.mrf.mxu0 }
0x105d   :  { %v2289_v10 = vpop.f32.mrf.mxu1 }
0x105e   :  { %v2268_v40 = vpop.f32.mrf.mxu0 }
0x105f   :  { %v2269_v20 = vadd.f32 %v2268_v40, %v2267_v38  ;;  %v2290_v42 = vpop.f32.mrf.mxu1 }
0x1060   :  { %v2270_v41 = vpop.f32.mrf.mxu0  ;;  %v2291_v43 = vadd.f32 %v2290_v42, %v2289_v10 }
0x1061   :  { %v2043_v14 = vadd.f32 %v2269_v20, %v2216_v39  ;;  %v2292_v44 = vpop.f32.mrf.mxu1 }
0x1062   :  { %v2271_v45 = vpop.f32.mrf.mxu0 }
0x1063   :  { %v2083_v46 = vadd.f32 %v2291_v43, %v2043_v14  ;;  %v2293_v0 = vpop.f32.mrf.mxu1 }
0x1065   :  { %2088 = vst [vmem:[#allocation16] sm:$0xff] %v2083_v46 }
0x1066   :  { %2701 = shalt.err (!%p2698_p2)
}
0x1067   :  { %2098 = dma.vmem_to_hbm [thread:$0]  %s2096_s27, 128, %s3089_s12, [#allocation7]  }
0x1068   :  { %2722 = dma.done.wait [#allocation7], 128  }
0x1069   :  { %2723 = vsyncadd [#allocation7], 4294967168 }
0x106a   :  { %2102 = vsyncpa [#allocation6], 1 }
0x106b   :  { %2103 = vsyncpa [#allocation9], 1 }
0x106c   :  { %2104 = vsyncpa [#allocation12], 1 }
0x106d   :  { %2105 = vsyncpa [#allocation15], 1 }
0x106e   :  { %2106 = vsyncpa [#allocation7], 1 }
0x106f   :  { %2107 = vsyncmov [#allocation4] }
0x1072   :  { %s2108_s30 = vpop.sfrf %2107 }
0x1073   :  { %p2249_p3 = scmp.ne.s32.totalorder %s2108_s30, 0 }
0x1075   :  { %2112 = shalt.err (%p2249_p3)  }
0x1076   :  { %2114 = vsyncmov [#allocation4 + $0x1] }
0x1079   :  { %s2115_s13 = vpop.sfrf %2114 }
0x107a   :  { %p2250_p4 = scmp.ne.s32.totalorder %s2115_s13, 0 }
0x107c   :  { %2119 = shalt.err (%p2250_p4)  }

</bundles_post_ra>
